<compile_context>
chip_gen: v7x
topology: tpu7x:2x2x1
jax: 0.10.0
libtpu: 0.0.40
codegen_flags: <defaults>
</compile_context>

<pallas_src>
import functools
import math

import jax
import jax.numpy as jnp
from jax.experimental import pallas as pl
from jax.experimental.pallas import tpu as pltpu


# ----------------------------- small helpers ------------------------------- #

def _round_up(x, m):
    return ((x + m - 1) // m) * m


def _vmem_capacity_bytes():
    """Physical VMEM of the current device; conservative 64 MiB fallback."""
    try:
        info = pltpu.get_tpu_info()
        cap = int(getattr(info, "vmem_capacity_bytes", 0) or 0)
        if cap > 0:
            return cap
    except Exception:
        pass
    return 64 << 20


def _sublane_multiple(compute_dtype):
    itemsize = jnp.dtype(compute_dtype).itemsize
    return max(8, 32 // max(1, itemsize))   # 8 for f32, 16 for bf16, 32 for 1-byte


def _pick_ffn_tile(ffn_dim, target):
    """Return (bf, ffn_padded): bf is a multiple-of-128 divisor of ffn_padded."""
    target = max(128, (target // 128) * 128)
    ffn_p = _round_up(ffn_dim, 128)
    if ffn_p <= target:
        return ffn_p, ffn_p
    t = target
    while t >= 128:
        if ffn_p % t == 0:
            return t, ffn_p
        t -= 128
    return 128, ffn_p


def _apply_activation(h, activation, approx_gelu):
    if activation == "relu":
        return jnp.maximum(h, 0.0)
    if activation == "gelu":
        if approx_gelu:
            # tanh approximation -> EUP slot instead of a VALU erf polynomial
            c = math.sqrt(2.0 / math.pi)
            return 0.5 * h * (1.0 + jnp.tanh(c * (h + 0.044715 * h * h * h)))
        # exact erf formulation (matches torch.nn.functional.gelu default)
        return 0.5 * h * (1.0 + jax.lax.erf(h * (1.0 / math.sqrt(2.0))))
    raise ValueError(f"unsupported activation in kernel: {activation}")


def _silu(x):
    return x * jax.nn.sigmoid(x)


# ------------------------------- kernels ----------------------------------- #

def _ffn_resident_kernel(x_ref, w1_ref, b1_ref, w2_ref, b2_ref, o_ref, *,
                         activation, compute_dtype, approx_gelu):
    """Full weights resident in VMEM; one fused fc1->act->fc2 per row tile."""
    x = x_ref[...].astype(compute_dtype)
    h = jnp.dot(x, w1_ref[...], preferred_element_type=jnp.float32) + b1_ref[...]
    h = _apply_activation(h, activation, approx_gelu)
    out = jnp.dot(h.astype(compute_dtype), w2_ref[...],
                  preferred_element_type=jnp.float32) + b2_ref[...]
    o_ref[...] = out.astype(o_ref.dtype)


def _ffn_swiglu_resident_kernel(x_ref, w1_ref, b1_ref, w3_ref, b3_ref,
                                w2_ref, b2_ref, o_ref, *, compute_dtype):
    x = x_ref[...].astype(compute_dtype)
    h1 = jnp.dot(x, w1_ref[...], preferred_element_type=jnp.float32) + b1_ref[...]
    h3 = jnp.dot(x, w3_ref[...], preferred_element_type=jnp.float32) + b3_ref[...]
    h = _silu(h1) * h3
    out = jnp.dot(h.astype(compute_dtype), w2_ref[...],
                  preferred_element_type=jnp.float32) + b2_ref[...]
    o_ref[...] = out.astype(o_ref.dtype)


def _ffn_tiled_kernel(x_ref, w1_ref, b1_ref, w2_ref, b2_ref, o_ref, acc_ref, *,
                      activation, compute_dtype, approx_gelu):
    """Accumulate act(x @ W1_j + b1_j) @ W2_j over ffn tiles j; finalize with b2."""
    j = pl.program_id(1)

    @pl.when(j == 0)
    def _():
        acc_ref[...] = jnp.zeros_like(acc_ref)

    x = x_ref[...].astype(compute_dtype)
    h = jnp.dot(x, w1_ref[...], preferred_element_type=jnp.float32) + b1_ref[...]
    h = _apply_activation(h, activation, approx_gelu)
    acc_ref[...] += jnp.dot(h.astype(compute_dtype), w2_ref[...],
                            preferred_element_type=jnp.float32)

    @pl.when(j == pl.num_programs(1) - 1)
    def _():
        o_ref[...] = (acc_ref[...] + b2_ref[...]).astype(o_ref.dtype)


def _ffn_swiglu_tiled_kernel(x_ref, w1_ref, b1_ref, w3_ref, b3_ref, w2_ref,
                             b2_ref, o_ref, acc_ref, *, compute_dtype):
    """Accumulate (silu(x@W1_j+b1_j) * (x@W3_j+b3_j)) @ W2_j over ffn tiles j."""
    j = pl.program_id(1)

    @pl.when(j == 0)
    def _():
        acc_ref[...] = jnp.zeros_like(acc_ref)

    x = x_ref[...].astype(compute_dtype)
    h1 = jnp.dot(x, w1_ref[...], preferred_element_type=jnp.float32) + b1_ref[...]
    h3 = jnp.dot(x, w3_ref[...], preferred_element_type=jnp.float32) + b3_ref[...]
    h = _silu(h1) * h3
    acc_ref[...] += jnp.dot(h.astype(compute_dtype), w2_ref[...],
                            preferred_element_type=jnp.float32)

    @pl.when(j == pl.num_programs(1) - 1)
    def _():
        o_ref[...] = (acc_ref[...] + b2_ref[...]).astype(o_ref.dtype)


# ------------------------------- wrapper ------------------------------------ #

def prepare_params(raw_params, *, activation="swiglu", compute_dtype=jnp.bfloat16):
    """One-time weight conversion (do this OUTSIDE the per-call path).

    raw_params hold pre-transposed Linear weights:
      w1: (emb, ffn)  b1: (ffn,)
      w2: (ffn, emb)  b2: (emb,)
      [swiglu] w3: (emb, ffn)  b3: (ffn,)
    Weights -> compute_dtype (bf16 by default); biases stay f32, shaped (1, dim).
    """
    cdtype = jnp.dtype(compute_dtype)
    p = {
        "w1": raw_params["w1"].astype(cdtype),
        "b1": raw_params["b1"].reshape(1, -1).astype(jnp.float32),
        "w2": raw_params["w2"].astype(cdtype),
        "b2": raw_params["b2"].reshape(1, -1).astype(jnp.float32),
    }
    if activation == "swiglu":
        p["w3"] = raw_params["w3"].astype(cdtype)
        p["b3"] = raw_params["b3"].reshape(1, -1).astype(jnp.float32)
    return p


def feed_forward(x, params, *, activation="swiglu", block_m=None, block_f=None,
                 resident_weights=None, approx_gelu=False, vmem_limit_bytes=None):
    """
    x:       [batch, seq, emb_dim] (any float dtype; cast to the weight dtype
             happens inside the kernel).
    params:  output of prepare_params() (weights already in the compute dtype,
             biases f32 shaped (1, dim)).
    block_m / block_f: row / ffn tiles; None -> generation-aware defaults.
    resident_weights:  True/False to force a path, None -> auto by VMEM fit.
    Returns [batch, seq, emb_dim] in x.dtype.
    """
    batch, seq, emb_dim = x.shape
    out_dtype = x.dtype
    swiglu = (activation == "swiglu")
    n_gate = 2 if swiglu else 1

    w1, w2 = params["w1"], params["w2"]
    cdtype = jnp.dtype(w1.dtype)                    # compute dtype = weight dtype
    ffn_dim = w1.shape[1]
    b1 = params["b1"].reshape(1, ffn_dim)
    b2 = params["b2"].reshape(1, emb_dim)
    if swiglu:
        w3 = params["w3"]
        b3 = params["b3"].reshape(1, ffn_dim)

    # ---------------- device-aware tile defaults & VMEM budget --------------- #
    cap = _vmem_capacity_bytes()
    budget = int(0.80 * cap)
    big_vmem = cap >= (100 << 20)                   # v5e/v6e (128 MiB) vs v7x (64 MiB)
    if block_m is None:
        block_m = 512 if big_vmem else 384
    if block_f is None:
        block_f = 512 if big_vmem else 256

    xb = jnp.dtype(x.dtype).itemsize
    cb = cdtype.itemsize
    ob = jnp.dtype(out_dtype).itemsize
    sub = _sublane_multiple(cdtype)                 # 16 for bf16, 8 for f32

    M = batch * seq
    bm = min(block_m, _round_up(M, sub))
    if bm >= 128:
        bm = (bm // 128) * 128                      # feed the 256x256 MXU cleanly
    else:
        bm = max(sub, (bm // sub) * sub)

    # ---------------- footprint models (double-buffered inputs) -------------- #
    def resident_fp(bm_):
        weights = ((n_gate * emb_dim * ffn_dim + ffn_dim * emb_dim) * cb
                   + (n_gate * ffn_dim + emb_dim) * 4)
        return (2 * weights
                + 2 * bm_ * emb_dim * xb            # x tile
                + 2 * bm_ * emb_dim * ob            # out tile
                + n_gate * bm_ * ffn_dim * 4        # h (,h3) f32
                + bm_ * ffn_dim * cb                # h cast for second dot
                + bm_ * emb_dim * 4)                # f32 result before cast

    if resident_weights is None:
        resident = resident_fp(bm) <= budget
    else:
        resident = bool(resident_weights)

    bf = ffn_p = ffn_dim
    if not resident:
        bf, ffn_p = _pick_ffn_tile(ffn_dim, block_f)

        def tiled_fp(bm_, bf_):
            return (2 * bm_ * emb_dim * xb
                    + 2 * n_gate * emb_dim * bf_ * cb
                    + 2 * bf_ * emb_dim * cb
                    + 2 * (n_gate * bf_ + emb_dim) * 4
                    + 2 * bm_ * emb_dim * ob
                    + bm_ * emb_dim * 4              # f32 accumulator scratch
                    + n_gate * bm_ * bf_ * 4         # h (,h3) f32
                    + bm_ * bf_ * cb)                # h cast for second dot

        # shrink ffn tile first (keep a divisor of ffn_p), then the row tile
        while tiled_fp(bm, bf) > budget and bf > 128:
            nb = bf - 128
            while nb > 128 and ffn_p % nb != 0:
                nb -= 128
            bf = max(128, nb)
        while tiled_fp(bm, bf) > budget and bm > sub:
            bm = max(sub, ((bm // 2) // sub) * sub)

        footprint = tiled_fp(bm, bf)
    else:
        footprint = resident_fp(bm)

    # ---------------- activations: flatten + pad rows (no dtype cast) -------- #
    m_pad = _round_up(M, bm)
    x2d = x.reshape(M, emb_dim)
    if m_pad != M:
        x2d = jnp.pad(x2d, ((0, m_pad - M), (0, 0)))

    # ffn padding only needed on the tiled path when no clean tile divisor exists
    if not resident and ffn_p != ffn_dim:
        # TODO(synk): fold this zero-padding into prepare_params (one-time cost).
        pad_c = ffn_p - ffn_dim
        w1 = jnp.pad(w1, ((0, 0), (0, pad_c)))
        b1 = jnp.pad(b1, ((0, 0), (0, pad_c)))
        w2 = jnp.pad(w2, ((0, pad_c), (0, 0)))
        if swiglu:
            w3 = jnp.pad(w3, ((0, 0), (0, pad_c)))
            b3 = jnp.pad(b3, ((0, 0), (0, pad_c)))

    # ---------------- scoped VMEM limit, capped at physical capacity --------- #
    if vmem_limit_bytes is None:
        vmem_limit_bytes = max(32 << 20, int(footprint * 1.5))
    vmem_limit_bytes = min(int(vmem_limit_bytes), int(0.9 * cap))

    out_shape = jax.ShapeDtypeStruct((m_pad, emb_dim), out_dtype)

    # ------------------------------ fast path -------------------------------- #
    if resident:
        grid = (m_pad // bm,)
        x_spec = pl.BlockSpec((bm, emb_dim), lambda i: (i, 0))
        o_spec = pl.BlockSpec((bm, emb_dim), lambda i: (i, 0))
        w1_spec = pl.BlockSpec((emb_dim, ffn_dim), lambda i: (0, 0))
        b1_spec = pl.BlockSpec((1, ffn_dim), lambda i: (0, 0))
        w3_spec = pl.BlockSpec((emb_dim, ffn_dim), lambda i: (0, 0))
        b3_spec = pl.BlockSpec((1, ffn_dim), lambda i: (0, 0))
        w2_spec = pl.BlockSpec((ffn_dim, emb_dim), lambda i: (0, 0))
        b2_spec = pl.BlockSpec((1, emb_dim), lambda i: (0, 0))

        cparams = pltpu.CompilerParams(
            dimension_semantics=("parallel",),
            vmem_limit_bytes=vmem_limit_bytes,
        )

        if swiglu:
            kernel = functools.partial(_ffn_swiglu_resident_kernel,
                                       compute_dtype=cdtype)
            in_specs = [x_spec, w1_spec, b1_spec, w3_spec, b3_spec, w2_spec, b2_spec]
            args = (x2d, w1, b1, w3, b3, w2, b2)
        else:
            kernel = functools.partial(_ffn_resident_kernel, activation=activation,
                                       compute_dtype=cdtype, approx_gelu=approx_gelu)
            in_specs = [x_spec, w1_spec, b1_spec, w2_spec, b2_spec]
            args = (x2d, w1, b1, w2, b2)

        out2d = pl.pallas_call(
            kernel,
            out_shape=out_shape,
            grid_spec=pltpu.PrefetchScalarGridSpec(
                num_scalar_prefetch=0, grid=grid,
                in_specs=in_specs, out_specs=o_spec, scratch_shapes=[]),
            compiler_params=cparams,
        )(*args)

    # ------------------------------ tiled path -------------------------------- #
    else:
        grid = (m_pad // bm, ffn_p // bf)           # (parallel rows, arbitrary ffn)
        x_spec = pl.BlockSpec((bm, emb_dim), lambda i, j: (i, 0))
        o_spec = pl.BlockSpec((bm, emb_dim), lambda i, j: (i, 0))  # const in j -> resident
        w1_spec = pl.BlockSpec((emb_dim, bf), lambda i, j: (0, j))
        b1_spec = pl.BlockSpec((1, bf), lambda i, j: (0, j))
        w3_spec = pl.BlockSpec((emb_dim, bf), lambda i, j: (0, j))
        b3_spec = pl.BlockSpec((1, bf), lambda i, j: (0, j))
        w2_spec = pl.BlockSpec((bf, emb_dim), lambda i, j: (j, 0))
        b2_spec = pl.BlockSpec((1, emb_dim), lambda i, j: (0, 0))

        cparams = pltpu.CompilerParams(
            dimension_semantics=("parallel", "arbitrary"),
            vmem_limit_bytes=vmem_limit_bytes,
        )
        scratch = [pltpu.VMEM((bm, emb_dim), jnp.float32)]

        if swiglu:
            kernel = functools.partial(_ffn_swiglu_tiled_kernel,
                                       compute_dtype=cdtype)
            in_specs = [x_spec, w1_spec, b1_spec, w3_spec, b3_spec, w2_spec, b2_spec]
            args = (x2d, w1, b1, w3, b3, w2, b2)
        else:
            kernel = functools.partial(_ffn_tiled_kernel, activation=activation,
                                       compute_dtype=cdtype, approx_gelu=approx_gelu)
            in_specs = [x_spec, w1_spec, b1_spec, w2_spec, b2_spec]
            args = (x2d, w1, b1, w2, b2)

        out2d = pl.pallas_call(
            kernel,
            out_shape=out_shape,
            grid_spec=pltpu.PrefetchScalarGridSpec(
                num_scalar_prefetch=0, grid=grid,
                in_specs=in_specs, out_specs=o_spec, scratch_shapes=scratch),
            compiler_params=cparams,
        )(*args)

    # dropout with p = config.ffn_dropout = 0.0 -> identity
    return out2d[:M].reshape(batch, seq, emb_dim)


# --------------------------- pure-JAX reference ----------------------------- #

def feed_forward_ref(x, raw_params, *, activation="swiglu", approx_gelu=False):
    """f32 reference on the raw (untransformed) parameters."""
    if activation == "swiglu":
        h = (_silu(x @ raw_params["w1"] + raw_params["b1"])
             * (x @ raw_params["w3"] + raw_params["b3"]))
        return h @ raw_params["w2"] + raw_params["b2"]
    h = x @ raw_params["w1"] + raw_params["b1"]
    h = _apply_activation(h, activation, approx_gelu)
    return h @ raw_params["w2"] + raw_params["b2"]


# --------------------------------- main ------------------------------------- #

def make_params(key, emb_dim, ffn_dim, swiglu):
    ks = jax.random.split(key, 6)
    s1 = 1.0 / math.sqrt(emb_dim)
    s2 = 1.0 / math.sqrt(ffn_dim)
    params = {
        # stored pre-transposed: (in_features, out_features)
        "w1": jax.random.uniform(ks[0], (emb_dim, ffn_dim), jnp.float32, -s1, s1),
        "b1": jax.random.uniform(ks[1], (ffn_dim,), jnp.float32, -s1, s1),
        "w2": jax.random.uniform(ks[2], (ffn_dim, emb_dim), jnp.float32, -s2, s2),
        "b2": jax.random.uniform(ks[3], (emb_dim,), jnp.float32, -s2, s2),
    }
    if swiglu:
        params["w3"] = jax.random.uniform(ks[4], (emb_dim, ffn_dim), jnp.float32, -s1, s1)
        params["b3"] = jax.random.uniform(ks[5], (ffn_dim,), jnp.float32, -s1, s1)
    return params


if __name__ == "__main__":
    # small but lane-dense config: emb_dim=128, ffn_dim=256, ffn_bias=True, ffn_dropout=0.0
    batch, seq, emb_dim, ffn_dim = 2, 72, 128, 256   # M = 144 -> exercises row padding
    key = jax.random.PRNGKey(0)
    kx, kp = jax.random.split(key)
    x = jax.random.normal(kx, (batch, seq, emb_dim), jnp.float32)

    raw_sw = make_params(kp, emb_dim, ffn_dim, swiglu=True)
    raw_mlp = make_params(kp, emb_dim, ffn_dim, swiglu=False)

    # bf16-rounded reference inputs (emulate the bf16 MXU path)
    def bf16_round(p):
        return {k: (v.astype(jnp.bfloat16).astype(jnp.float32) if k.startswith("w") else v)
                for k, v in p.items()}
    x_bf = x.astype(jnp.bfloat16).astype(jnp.float32)

    # 1) swiglu, bf16 MXU path, auto -> resident-weights fast path
    p_sw_bf16 = prepare_params(raw_sw, activation="swiglu", compute_dtype=jnp.bfloat16)
    out1 = jax.block_until_ready(feed_forward(x, p_sw_bf16, activation="swiglu"))
    ref_sw = feed_forward_ref(x_bf, bf16_round(raw_sw), activation="swiglu")
    assert out1.shape == (batch, seq, emb_dim)
    assert jnp.allclose(out1, ref_sw, atol=5e-2, rtol=5e-2), \
        float(jnp.max(jnp.abs(out1 - ref_sw)))

    # 2) swiglu, bf16, forced tiled accumulate path (rows 144->192 padded, ffn 2x128)
    out2 = jax.block_until_ready(
        feed_forward(x, p_sw_bf16, activation="swiglu", resident_weights=False,
                     block_m=64, block_f=128))
    assert jnp.allclose(out2, ref_sw, atol=5e-2, rtol=5e-2), \
        float(jnp.max(jnp.abs(out2 - ref_sw)))

    # 3) relu, f32 compute, forced tiled path, tight tolerance
    p_mlp_f32 = prepare_params(raw_mlp, activation="relu", compute_dtype=jnp.float32)
    out3 = jax.block_until_ready(
        feed_forward(x, p_mlp_f32, activation="relu", resident_weights=False,
                     block_m=128, block_f=128))
    ref_relu = feed_forward_ref(x, raw_mlp, activation="relu")
    assert jnp.allclose(out3, ref_relu, atol=1e-4, rtol=1e-4), \
        float(jnp.max(jnp.abs(out3 - ref_relu)))

    # 4) gelu (exact erf, matches F.gelu default), f32, auto -> resident fast path
    out4 = jax.block_until_ready(feed_forward(x, p_mlp_f32, activation="gelu"))
    ref_gelu = feed_forward_ref(x, raw_mlp, activation="gelu")
    assert jnp.allclose(out4, ref_gelu, atol=1e-4, rtol=1e-4), \
        float(jnp.max(jnp.abs(out4 - ref_gelu)))

    print("KERNEL_OK")
</pallas_src>

<mosaic_0001>
module attributes {stable_mosaic.version = 11 : i64} {
  func.func @_ffn_swiglu_resident_kernel(%arg0: i32, %arg1: memref<128x128xf32, #tpu.memory_space<vmem>>, %arg2: memref<128x256xbf16, #tpu.memory_space<vmem>>, %arg3: memref<1x256xf32, #tpu.memory_space<vmem>>, %arg4: memref<128x256xbf16, #tpu.memory_space<vmem>>, %arg5: memref<1x256xf32, #tpu.memory_space<vmem>>, %arg6: memref<256x128xbf16, #tpu.memory_space<vmem>>, %arg7: memref<1x128xf32, #tpu.memory_space<vmem>>, %arg8: memref<128x128xf32, #tpu.memory_space<vmem>>) attributes {dimension_semantics = [#tpu.dimension_semantics<parallel>], iteration_bounds = array<i64: 2>, scalar_prefetch = 0 : i64, scratch_operands = 0 : i64, tpu.core_type = #tpu.core_type<tc>, window_params = [{transform_indices = @transform_0, window_bounds = array<i64: 128, 128>}, {pipeline_mode = #tpu.pipeline_mode<synchronous>, transform_indices = @transform_1, window_bounds = array<i64: 128, 256>}, {pipeline_mode = #tpu.pipeline_mode<synchronous>, transform_indices = @transform_2, window_bounds = array<i64: 1, 256>}, {pipeline_mode = #tpu.pipeline_mode<synchronous>, transform_indices = @transform_3, window_bounds = array<i64: 128, 256>}, {pipeline_mode = #tpu.pipeline_mode<synchronous>, transform_indices = @transform_4, window_bounds = array<i64: 1, 256>}, {pipeline_mode = #tpu.pipeline_mode<synchronous>, transform_indices = @transform_5, window_bounds = array<i64: 256, 128>}, {pipeline_mode = #tpu.pipeline_mode<synchronous>, transform_indices = @transform_6, window_bounds = array<i64: 1, 128>}, {transform_indices = @transform_7, window_bounds = array<i64: 128, 128>}]} {
    %c0 = arith.constant 0 : index
    %c0_0 = arith.constant 0 : index
    %0 = vector.load %arg1[%c0, %c0_0] : memref<128x128xf32, #tpu.memory_space<vmem>>, vector<128x128xf32>
    %1 = arith.truncf %0 : vector<128x128xf32> to vector<128x128xbf16>
    %c0_1 = arith.constant 0 : index
    %c0_2 = arith.constant 0 : index
    %2 = vector.load %arg2[%c0_1, %c0_2] : memref<128x256xbf16, #tpu.memory_space<vmem>>, vector<128x256xbf16>
    %cst = arith.constant dense<0.000000e+00> : vector<128x256xf32>
    %3 = tpu.matmul %1, %2, %cst {dimension_numbers = #tpu.dot_dimension_numbers<[1], [0], [0], [1], [0, 0, 1, 1], [], []>} : vector<128x128xbf16>, vector<128x256xbf16>, vector<128x256xf32> -> vector<128x256xf32>
    %c0_3 = arith.constant 0 : index
    %c0_4 = arith.constant 0 : index
    %4 = vector.load %arg3[%c0_3, %c0_4] : memref<1x256xf32, #tpu.memory_space<vmem>>, vector<1x256xf32>
    %5 = vector.broadcast %4 : vector<1x256xf32> to vector<128x256xf32>
    %6 = arith.addf %3, %5 : vector<128x256xf32>
    %c0_5 = arith.constant 0 : index
    %c0_6 = arith.constant 0 : index
    %7 = vector.load %arg4[%c0_5, %c0_6] : memref<128x256xbf16, #tpu.memory_space<vmem>>, vector<128x256xbf16>
    %cst_7 = arith.constant dense<0.000000e+00> : vector<128x256xf32>
    %8 = tpu.matmul %1, %7, %cst_7 {dimension_numbers = #tpu.dot_dimension_numbers<[1], [0], [0], [1], [0, 0, 1, 1], [], []>} : vector<128x128xbf16>, vector<128x256xbf16>, vector<128x256xf32> -> vector<128x256xf32>
    %c0_8 = arith.constant 0 : index
    %c0_9 = arith.constant 0 : index
    %9 = vector.load %arg5[%c0_8, %c0_9] : memref<1x256xf32, #tpu.memory_space<vmem>>, vector<1x256xf32>
    %10 = vector.broadcast %9 : vector<1x256xf32> to vector<128x256xf32>
    %11 = arith.addf %8, %10 : vector<128x256xf32>
    %12 = arith.negf %6 : vector<128x256xf32>
    %13 = math.exp %12 : vector<128x256xf32>
    %cst_10 = arith.constant 1.000000e+00 : f32
    %14 = vector.broadcast %cst_10 : f32 to vector<128x256xf32>
    %15 = arith.addf %14, %13 : vector<128x256xf32>
    %16 = arith.divf %14, %15 : vector<128x256xf32>
    %17 = arith.mulf %6, %16 : vector<128x256xf32>
    %18 = arith.mulf %17, %11 : vector<128x256xf32>
    %19 = arith.truncf %18 : vector<128x256xf32> to vector<128x256xbf16>
    %c0_11 = arith.constant 0 : index
    %c0_12 = arith.constant 0 : index
    %20 = vector.load %arg6[%c0_11, %c0_12] : memref<256x128xbf16, #tpu.memory_space<vmem>>, vector<256x128xbf16>
    %cst_13 = arith.constant dense<0.000000e+00> : vector<128x128xf32>
    %21 = tpu.matmul %19, %20, %cst_13 {dimension_numbers = #tpu.dot_dimension_numbers<[1], [0], [0], [1], [0, 0, 1, 1], [], []>} : vector<128x256xbf16>, vector<256x128xbf16>, vector<128x128xf32> -> vector<128x128xf32>
    %c0_14 = arith.constant 0 : index
    %c0_15 = arith.constant 0 : index
    %22 = vector.load %arg7[%c0_14, %c0_15] : memref<1x128xf32, #tpu.memory_space<vmem>>, vector<1x128xf32>
    %23 = vector.broadcast %22 : vector<1x128xf32> to vector<128x128xf32>
    %24 = arith.addf %21, %23 : vector<128x128xf32>
    %c0_16 = arith.constant 0 : index
    %c0_17 = arith.constant 0 : index
    %25 = vector.load %arg8[%c0_16, %c0_17] : memref<128x128xf32, #tpu.memory_space<vmem>>, vector<128x128xf32>
    tpu.vector_store %arg8[%c0_16, %c0_17], %24 {strides = array<i32>} : memref<128x128xf32, #tpu.memory_space<vmem>>, vector<128x128xf32>,
    return
  }
  func.func @transform_0(%arg0: i32) -> (i32, i32) {
    %c0_i32 = arith.constant 0 : i32
    %c0_i32_0 = arith.constant 0 : i32
    return %arg0, %c0_i32 : i32, i32
  }
  func.func @transform_1(%arg0: i32) -> (i32, i32) {
    %c0_i32 = arith.constant 0 : i32
    %c0_i32_0 = arith.constant 0 : i32
    %c0_i32_1 = arith.constant 0 : i32
    return %c0_i32, %c0_i32_0 : i32, i32
  }
  func.func @transform_2(%arg0: i32) -> (i32, i32) {
    %c0_i32 = arith.constant 0 : i32
    %c0_i32_0 = arith.constant 0 : i32
    %c0_i32_1 = arith.constant 0 : i32
    return %c0_i32, %c0_i32_0 : i32, i32
  }
  func.func @transform_3(%arg0: i32) -> (i32, i32) {
    %c0_i32 = arith.constant 0 : i32
    %c0_i32_0 = arith.constant 0 : i32
    %c0_i32_1 = arith.constant 0 : i32
    return %c0_i32, %c0_i32_0 : i32, i32
  }
  func.func @transform_4(%arg0: i32) -> (i32, i32) {
    %c0_i32 = arith.constant 0 : i32
    %c0_i32_0 = arith.constant 0 : i32
    %c0_i32_1 = arith.constant 0 : i32
    return %c0_i32, %c0_i32_0 : i32, i32
  }
  func.func @transform_5(%arg0: i32) -> (i32, i32) {
    %c0_i32 = arith.constant 0 : i32
    %c0_i32_0 = arith.constant 0 : i32
    %c0_i32_1 = arith.constant 0 : i32
    return %c0_i32, %c0_i32_0 : i32, i32
  }
  func.func @transform_6(%arg0: i32) -> (i32, i32) {
    %c0_i32 = arith.constant 0 : i32
    %c0_i32_0 = arith.constant 0 : i32
    %c0_i32_1 = arith.constant 0 : i32
    return %c0_i32, %c0_i32_0 : i32, i32
  }
  func.func @transform_7(%arg0: i32) -> (i32, i32) {
    %c0_i32 = arith.constant 0 : i32
    %c0_i32_0 = arith.constant 0 : i32
    return %arg0, %c0_i32 : i32, i32
  }
}

</mosaic_0001>

<bundles_post_ra>
// kernel: tpu_custom_call.1
= control target key start
LH: loop header
LB: loop body
LE: loop exit
PB: predicated region body
PF: predicated region fallthrough
CT: control target
= control target key end

     0   :  { %12 = vsyncpa [#allocation3], 0  ;;  %s2803_s0 = inlined_call_operand.hbm [shape: f32[256,128], index: 0, kind: input, shape index: {}]   ;;  %s2804_s1 = inlined_call_operand.hbm [shape: bf16[128,256], index: 1, kind: input, shape index: {}]   ;;  %s2805_s2 = inlined_call_operand.vmem [shape: f32[1,256], index: 2, kind: input, shape index: {}]   ;;  %s2806_s3 = inlined_call_operand.hbm [shape: bf16[128,256], index: 3, kind: input, shape index: {}]   ;;  %s2807_s4 = inlined_call_operand.vmem [shape: f32[1,256], index: 4, kind: input, shape index: {}]   ;;  %s2808_s5 = inlined_call_operand.hbm [shape: bf16[256,128], index: 5, kind: input, shape index: {}]   ;;  %s2809_s6 = inlined_call_operand.vmem [shape: f32[1,128], index: 6, kind: input, shape index: {}]   ;;  %s2810_s7 = inlined_call_operand.hbm [shape: f32[256,128], index: 7, kind: output, shape index: {}]  }
   0x1   :  { %14 = vsyncpa [#allocation3 + $0x1], 0 }
   0x2   :  { %15 = vsyncpa [#allocation6], 0 }
   0x3   :  { %16 = vsyncpa [#allocation9], 0 }
   0x4   :  { %17 = vsyncpa [#allocation4], 0 }
   0x5   :  { %19 = vsyncpa [#allocation4 + $0x1], 0  ;;  %s2147_s24 = smov 0   ;;  %s2149_s25 = smov 0  }
   0x6   :  { %s2151_s26 = smov 0   ;;  %s2153_s27 = smov 0  }
   0x7 LB: > { %s2168_s28 = sadd.s32 4294967295, %s2093_s27   ;;  %s1446_s29 = sadd.s32 4294967294, %s2093_s27   ;;  %s2093_s27 = sphi %s2153_s27, %s2836_s27   ;;  %s2089_s26 = sphi %s2151_s26, %s2835_s26   ;;  %s2085_s25 = sphi %s2149_s25, %s2834_s25   ;;  %s2081_s24 = sphi %s2147_s24, %s2833_s24  }
   0x8   : > { %p45_p0 = scmp.ne.s32.totalorder %s2085_s25, %s2081_s24  ;;  %p2811_p1 = scmp.eq.s32.totalorder %s2168_s28, 0 }
   0x9   : > { %p201_p3 = scmp.eq.s32.totalorder %s1446_s29, 1  ;;  %p1447_p5 = scmp.ge.s32.totalorder %s2093_s27, 1 }
   0xa   : > { %p2177_p4 = por %p2811_p1, %p45_p0  ;;  %p208_p7 = scmp.lt.s32.totalorder %s2093_s27, 3 }
   0xb   : > { %p2182_p6 = por %p201_p3, %p45_p0  ;;  %s2095_s10 = smov [#allocation5]  }
   0xc   : > { %s2815_s30 = scalar_select %p2177_p4, 1, 0 }
   0xd   : > { %s2816_s8 = scalar_select %p2182_p6, 1, 0 }
   0xe   : > { %p2187_p8 = pnand %p1447_p5, %p208_p7  ;;  %s220_s11 = sshll.u32 %s2095_s10, 4  ;;  %s2191_s11 = int_to_ptr.vmem [resolvable:$true] %s220_s11 }
   0xf   : > { %2817 = sst [smem:[#allocation15_spill]] %s2816_s8  ;;  %s2096_s13 = smov [#allocation7]  }
  0x10   : > { %s2818_s9 = scalar_select %p2187_p8, 1, 0 }
  0x11   : > { %p1645_p9 = pneg %p2187_p8  ;;  %s236_s14 = sshll.u32 %s2096_s13, 4  ;;  %s2202_s14 = int_to_ptr.vmem [resolvable:$true] %s236_s14 }
  0x12   : > { %s2097_s15 = smov [#allocation8]   ;;  %s1905_s19 = scalar_lea.hbm %s2804_s1, 2048 }
  0x13   : > { %p2198_p11 = pnand %p1645_p9, %p2811_p1  ;;  %s2204_s16 = sshll.u32 %s2097_s15, 4  ;;  %s253_s16 = int_to_ptr.vmem [resolvable:$true] %s2204_s16 }
  0x14   : > { %p1906_p12 = scmp.ne.s32.totalorder %s2804_s1, %s1905_s19  ;;  %p1912_p5 = scmp.lt.u32.totalorder %s1905_s19, %s2804_s1 }
  0x15   : > { %p2214_p13 = pneg %p2198_p11 }
  0x17   : > { %p1908_p0 = pnand %p2214_p13, %p1906_p12 }
  0x19   : > { %p1909_p3 = pneg %p1908_p0 }
  0x1b   : > { %p1914_p7 = pnand %p1912_p5, %p1909_p3 }
  0x1d   : > { %1917 = shalt.err (!%p1914_p7)
}
  0x1e   : > { %s1918_s10 = scalar_lea.vmem %s2191_s11, 2048  ;;  %p1926_p2 = scmp.lt.s32.totalorder %s2191_s11, %s2191_s11 }
  0x1f   : > { %p1919_p9 = scmp.ne.s32.totalorder %s2191_s11, %s1918_s10  ;;  %p1927_p6 = scmp.lt.s32.totalorder %s1918_s10, %s1918_s10 }
  0x21   : > { %p1921_p10 = pnand %p1919_p9, %p2214_p13  ;;  %p1928_p12 = por %p1927_p6, %p1926_p2 }
  0x23   : > { %p1922_p1 = pneg %p1921_p10 }
  0x25   : > { %p1929_p0 = pnand %p1928_p12, %p1922_p1 }
  0x27   : > { %1932 = shalt.err (!%p1929_p0)
}
  0x28   : > { %s2098_s13 = smov 128   ;;  %s2099_s15 = smov 8  }
  0x29   : > { %1648 = dma.hbm_to_vmem [thread:$0]  (!%p2198_p11), %s2804_s1, 2048, %s2191_s11, [#allocation6], %s2098_s13, %s2098_s13, %s2099_s15  }
  0x2a   : > { %s1933_s21 = scalar_lea.hbm %s2806_s3, 2048 }
  0x2b   : > { %p1934_p1 = scmp.ne.s32.totalorder %s2806_s3, %s1933_s21  ;;  %p1940_p10 = scmp.lt.u32.totalorder %s1933_s21, %s2806_s3 }
  0x2d   : > { %p1936_p2 = pnand %p1934_p1, %p2214_p13 }
  0x2f   : > { %p1937_p6 = pneg %p1936_p2 }
  0x31   : > { %p1942_p3 = pnand %p1940_p10, %p1937_p6 }
  0x33   : > { %1945 = shalt.err (!%p1942_p3)
}
  0x34   : > { %s1946_s11 = scalar_lea.vmem %s2202_s14, 2048  ;;  %p1954_p12 = scmp.lt.s32.totalorder %s2202_s14, %s2202_s14 }
  0x35   : > { %p1947_p5 = scmp.ne.s32.totalorder %s2202_s14, %s1946_s11  ;;  %p1955_p0 = scmp.lt.s32.totalorder %s1946_s11, %s1946_s11 }
  0x37   : > { %p1949_p7 = pnand %p1947_p5, %p2214_p13  ;;  %p1956_p1 = por %p1955_p0, %p1954_p12 }
  0x39   : > { %p1950_p9 = pneg %p1949_p7 }
  0x3b   : > { %p1957_p2 = pnand %p1956_p1, %p1950_p9 }
  0x3d   : > { %1960 = shalt.err (!%p1957_p2)
}
  0x3e   : > { %1651 = dma.hbm_to_vmem [thread:$0]  (!%p2198_p11), %s2806_s3, 2048, %s2202_s14, [#allocation6], %s2098_s13, %s2098_s13, %s2099_s15  }
  0x3f   : > { %s1961_s20 = scalar_lea.hbm %s2808_s5, 2048 }
  0x40   : > { %p1962_p6 = scmp.ne.s32.totalorder %s2808_s5, %s1961_s20  ;;  %p1968_p5 = scmp.lt.u32.totalorder %s1961_s20, %s2808_s5 }
  0x42   : > { %p1964_p10 = pnand %p1962_p6, %p2214_p13 }
  0x44   : > { %p1965_p3 = pneg %p1964_p10 }
  0x46   : > { %p1970_p7 = pnand %p1968_p5, %p1965_p3 }
  0x48   : > { %1973 = shalt.err (!%p1970_p7)
}
  0x49   : > { %s1974_s11 = scalar_lea.vmem %s253_s16, 2048  ;;  %p1982_p1 = scmp.lt.s32.totalorder %s253_s16, %s253_s16 }
  0x4a   : > { %p1975_p9 = scmp.ne.s32.totalorder %s253_s16, %s1974_s11  ;;  %p1983_p2 = scmp.lt.s32.totalorder %s1974_s11, %s1974_s11 }
  0x4c   : > { %p1977_p12 = pnand %p1975_p9, %p2214_p13  ;;  %p1984_p4 = por %p1983_p2, %p1982_p1 }
  0x4e   : > { %p1978_p0 = pneg %p1977_p12 }
  0x50   : > { %p1985_p8 = pnand %p1984_p4, %p1978_p0 }
  0x52   : > { %1988 = shalt.err (!%p1985_p8)
}
  0x53   : > { %s2100_s14 = smov 64   ;;  %s2101_s22 = smov 4  }
  0x54   : > { %1654 = dma.hbm_to_vmem [thread:$0]  (!%p2198_p11), %s2808_s5, 2048, %s253_s16, [#allocation9], %s2100_s14, %s2100_s14, %s2101_s22  }
  0x55   : > { %s2284_s18 = sadd.s32 1, %s2093_s27   ;;  %s32_s20 = sadd.s32 1, %s2089_s26 }
  0x56   : > { %s29_s19 = ssub.s32 %s2093_s27, %s2284_s18  ;;  %p39_p8 = scmp.ne.s32.totalorder %s2089_s26, %s2085_s25 }
  0x57   : > { %p30_p4 = scmp.eq.s32.totalorder %s29_s19, 0  ;;  %p40_p13 = scmp.eq.s32.totalorder %s2093_s27, 0 }
  0x58   : > { %p1666_p6 = scmp.lt.s32.totalorder %s2093_s27, 2  ;;  %p2821_p3 = scmp.eq.s32.totalorder %s2168_s28, 1 }
  0x59   : > { %s2294_s21 = scalar_select %p30_p4, %s2089_s26, %s32_s20  }
  0x5a   : > { %p41_p10 = por %p40_p13, %p39_p8  ;;  %p2298_p5 = por %p2821_p3, %p39_p8 }
  0x5b   : > { %s269_s12 = sand.u32 1, %s2089_s26   ;;  %s1547_s29 = sshll.u32 %s2093_s27, 11 }
  0x5c   : > { %s1452_s16 = sshll.u32 %s269_s12, 7  ;;  %s2307_s14 = scalar_lea.hbm %s2803_s0, %s1547_s29 }
  0x5d   : > { %s273_s22 = scalar_lea.vmem [#allocation2], %s1452_s16  ;;  %p2309_p11 = pnand %p1666_p6, %p41_p10 }
  0x5e   : > { %s280_s8 = sshll.u32 %s273_s22, 4  ;;  %s2315_s19 = scalar_lea.sflag [#allocation3], %s269_s12  ;;  %s2313_s8 = int_to_ptr.vmem [resolvable:$true] %s280_s8 }
  0x5f   : > { %s1989_s20 = scalar_lea.hbm %s2307_s14, 2048  ;;  %p1991_p9 = pneg %p2309_p11 }
  0x60   : > { %p1990_p7 = scmp.ne.s32.totalorder %s2307_s14, %s1989_s20  ;;  %s1994_s10 = scalar_lea.hbm %s2803_s0, 4096 }
  0x61   : > { %p1995_p1 = scmp.lt.u32.totalorder %s2307_s14, %s2803_s0  ;;  %p1996_p2 = scmp.lt.u32.totalorder %s1994_s10, %s1989_s20 }
  0x62   : > { %p1992_p12 = pnand %p1991_p9, %p1990_p7  ;;  %p1998_p8 = scmp.lt.u32.totalorder %s1989_s20, %s2307_s14 }
  0x63   : > { %p1997_p4 = por %p1996_p2, %p1995_p1 }
  0x64   : > { %p1993_p0 = pneg %p1992_p12 }
  0x65   : > { %p1999_p13 = por %p1998_p8, %p1997_p4 }
  0x67   : > { %p2000_p6 = pnand %p1999_p13, %p1993_p0 }
  0x69   : > { %2003 = shalt.err (!%p2000_p6)
}
  0x6a   : > { %s2004_s12 = scalar_lea.vmem %s2313_s8, 2048  ;;  %s2102_s29 = smov [#allocation2]  }
  0x6b   : > { %p2005_p10 = scmp.ne.s32.totalorder %s2313_s8, %s2004_s12  ;;  %s2009_s16 = sshll.u32 %s2102_s29, 4  ;;  %s2010_s16 = int_to_ptr.vmem [resolvable:$false] %s2009_s16 }
  0x6c   : > { %s2011_s11 = scalar_lea.vmem %s2010_s16, 4096  ;;  %p2012_p12 = scmp.lt.s32.totalorder %s2313_s8, %s2010_s16 }
  0x6d   : > { %p2007_p3 = pnand %p2005_p10, %p1991_p9  ;;  %p2013_p1 = scmp.lt.s32.totalorder %s2011_s11, %s2004_s12 }
  0x6f   : > { %p2008_p7 = pneg %p2007_p3  ;;  %p2014_p2 = por %p2013_p1, %p2012_p12 }
  0x71   : > { %p2015_p4 = pnand %p2014_p2, %p2008_p7 }
  0x73   : > { %2018 = shalt.err (!%p2015_p4)
}
  0x74   : > { %1658 = dma.hbm_to_vmem [thread:$0]  (!%p2309_p11), %s2307_s14, 2048, %s2313_s8, %s2315_s19, %s2098_s13, %s2098_s13, %s2099_s15  }
  0x75   : > { %p2824_p9 = scmp.ne.s32.totalorder %s2818_s9, 0 }
  0x76   : > { %s2349_s20 = sand.u32 (!%p2824_p9), 1, %s2085_s25   ;;  %p2825_p0 = scmp.ne.s32.totalorder (!%p2824_p9), %s2815_s30, 0 }
  0x77   : > { %292 = sbr.rel (%p2824_p9) target bundleno = 737 (0x2e1), region = 48  ;;  %s1456_s10 = sshll.u32 (!%p2824_p9), %s2349_s20, 7 }
  0x78   : > { %s295_s22 = scalar_lea.sflag (!%p2824_p9), [#allocation3], %s2349_s20  ;;  %s2355_s17 = scalar_lea.vmem (!%p2824_p9), [#allocation2], %s1456_s10 }
  0x7e   : > { %2064 = dma.done.wait (%p2825_p0), %s295_s22, 2048  }
  0x7f   : > { %2066 = vsyncadd (%p2825_p0), %s295_s22, 4294965248  ;;  %p2826_p11 = scmp.eq.s32.totalorder %s2168_s28, 0 }
  0x81   : > { %2068 = dma.done.wait (%p2826_p11), [#allocation6], 4096   ;;  %p2827_p8 = pmov %p2826_p11 }
  0x83   : > { %2070 = vsyncadd (%p2827_p8), [#allocation6], 4294963200  ;;  %p2828_p13 = pmov %p2827_p8 }
  0x84   : > { %p2829_p6 = pmov %p2827_p8 }
  0x85   : > { %2072 = dma.done.wait (%p2828_p13), [#allocation9], 2048  }
  0x86   : > { %2074 = vsyncadd (%p2829_p6), [#allocation9], 4294965248  ;;  %v2103_v0 = vmov 0   ;;  %v1713_v1 = vld [vmem:[#allocation5 + $0x4] ss:$8 sps:$4 sm:$0xff]   ;;  %v346_v27 = vld [vmem:[%s2355_s17 + $0x10] sm:$0xff] }
  0x87   : > { %508 = vmatprep.mubr.bf16.mxu0 %v2103_v0  ;;  %548 = vmatprep.mubr.bf16.mxu1 %v2103_v0  ;;  %v1715_v2 = vld [vmem:[#allocation5] ss:$8 sps:$4 sm:$0xff]   ;;  %v1716_v3 = vld [vmem:[#allocation5 + $0x14] ss:$8 sps:$4 sm:$0xff]   ;;  %v1718_v4 = vld [vmem:[#allocation5 + $0x10] ss:$8 sps:$4 sm:$0xff]  }
  0x88   : > { %476 = vmatprep.subr.bf16.mxu0 %v1713_v1  ;;  %1613 = vmatprep.subr.bf16.mxu1 %v1713_v1  ;;  %v1719_v5 = vld [vmem:[#allocation5 + $0x24] ss:$8 sps:$4 sm:$0xff]   ;;  %v1721_v6 = vld [vmem:[#allocation5 + $0x20] ss:$8 sps:$4 sm:$0xff]   ;;  %v1722_v7 = vld [vmem:[#allocation5 + $0x34] ss:$8 sps:$4 sm:$0xff]  }
  0x89   : > { %477 = vmatpush1.bf16.msra.mxu0 %v1715_v2  ;;  %1621 = vmatpush1.bf16.msra.mxu1 %v1715_v2  ;;  %v1724_v8 = vld [vmem:[#allocation5 + $0x30] ss:$8 sps:$4 sm:$0xff]   ;;  %v1725_v9 = vld [vmem:[#allocation5 + $0x44] ss:$8 sps:$4 sm:$0xff]   ;;  %v1727_v10 = vld [vmem:[#allocation5 + $0x40] ss:$8 sps:$4 sm:$0xff]  }
  0x8a   : > { %478 = vmatprep.subr.bf16.mxu0 %v1716_v3  ;;  %1614 = vmatprep.subr.bf16.mxu1 %v1716_v3  ;;  %v1728_v11 = vld [vmem:[#allocation5 + $0x54] ss:$8 sps:$4 sm:$0xff]   ;;  %v1730_v12 = vld [vmem:[#allocation5 + $0x50] ss:$8 sps:$4 sm:$0xff]   ;;  %v1731_v13 = vld [vmem:[#allocation5 + $0x64] ss:$8 sps:$4 sm:$0xff]  }
  0x8b   : > { %v1733_v14 = vld [vmem:[#allocation5 + $0x60] ss:$8 sps:$4 sm:$0xff]   ;;  %v1734_v15 = vld [vmem:[#allocation5 + $0x74] ss:$8 sps:$4 sm:$0xff]   ;;  %v1736_v16 = vld [vmem:[#allocation5 + $0x70] ss:$8 sps:$4 sm:$0xff]  }
  0x8c   : > { %v344_v17 = vld [vmem:[%s2355_s17] sm:$0xff]  ;;  %v345_v18 = vld [vmem:[%s2355_s17 + $0x8] sm:$0xff]  ;;  %v1742_v25 = vld [vmem:[#allocation7 + $0x14] ss:$8 sps:$4 sm:$0xff]   ;;  %s2719_s19 = scalar_lea.vmem [#allocation10], %s1456_s10  ;;  %s1548_s12 = sshll.u32 %s2168_s28, 11 }
  0x8d   : > { %479 = vmatpush1.bf16.msra.mxu0 %v1718_v4  ;;  %1622 = vmatpush1.bf16.msra.mxu1 %v1718_v4  ;;  %v352_v19 = vld [vmem:[%s2355_s17 + $0x40] sm:$0xff]  ;;  %v353_v20 = vld [vmem:[%s2355_s17 + $0x48] sm:$0xff]  ;;  %v2375_v23 = vpack.c.bf16 %v345_v18, %v344_v17  ;;  %v1740_v26 = vld [vmem:[#allocation7 + $0x10] ss:$8 sps:$4 sm:$0xff]   ;;  %s1344_s29 = sshll.u32 %s2719_s19, 4  ;;  %s2754_s10 = scalar_lea.hbm %s2810_s7, %s1548_s12  ;;  %s2756_s29 = int_to_ptr.vmem [resolvable:$true] %s1344_s29 }
  0x8e   : > { %480 = vmatprep.subr.bf16.mxu0 %v1719_v5  ;;  %1615 = vmatprep.subr.bf16.mxu1 %v1719_v5  ;;  %v1739_v21 = vld [vmem:[#allocation7 + $0x4] ss:$8 sps:$4 sm:$0xff]   ;;  %v1737_v22 = vld [vmem:[#allocation7] ss:$8 sps:$4 sm:$0xff]   ;;  %v2377_v24 = vpack.c.bf16 %v353_v20, %v352_v19  ;;  %v347_v28 = vld [vmem:[%s2355_s17 + $0x18] sm:$0xff]  ;;  %s1331_s28 = scalar_lea.sflag [#allocation4], %s2349_s20 }
  0x8f   : > { %v354_v29 = vld [vmem:[%s2355_s17 + $0x50] sm:$0xff]  ;;  %v355_v30 = vld [vmem:[%s2355_s17 + $0x58] sm:$0xff]  ;;  %v1745_v31 = vld [vmem:[#allocation7 + $0x24] ss:$8 sps:$4 sm:$0xff]   ;;  %v361_v32 = vpack.c.bf16 %v347_v28, %v346_v27  ;;  %s2019_s22 = scalar_lea.vmem %s2756_s29, 2048 }
  0x90   : > { %v365_v33 = vpack.c.bf16 %v355_v30, %v354_v29  ;;  %v1743_v34 = vld [vmem:[#allocation7 + $0x20] ss:$8 sps:$4 sm:$0xff]   ;;  %v1748_v35 = vld [vmem:[#allocation7 + $0x34] ss:$8 sps:$4 sm:$0xff]   ;;  %v1746_v36 = vld [vmem:[#allocation7 + $0x30] ss:$8 sps:$4 sm:$0xff]   ;;  %p2020_p10 = scmp.ne.s32.totalorder %s2756_s29, %s2019_s22 }
  0x91   : > { %481 = vmatpush1.bf16.msra.mxu0 %v1721_v6  ;;  %1623 = vmatpush1.bf16.msra.mxu1 %v1721_v6  ;;  %v348_v37 = vld [vmem:[%s2355_s17 + $0x20] sm:$0xff]  ;;  %v349_v38 = vld [vmem:[%s2355_s17 + $0x28] sm:$0xff]  ;;  %v1754_v45 = vld [vmem:[#allocation7 + $0x54] ss:$8 sps:$4 sm:$0xff]  }
  0x92   : > { %482 = vmatprep.subr.bf16.mxu0 %v1722_v7  ;;  %1616 = vmatprep.subr.bf16.mxu1 %v1722_v7  ;;  %v356_v39 = vld [vmem:[%s2355_s17 + $0x60] sm:$0xff]  ;;  %v357_v40 = vld [vmem:[%s2355_s17 + $0x68] sm:$0xff]  ;;  %v362_v42 = vpack.c.bf16 %v349_v38, %v348_v37  ;;  %v1752_v46 = vld [vmem:[#allocation7 + $0x50] ss:$8 sps:$4 sm:$0xff]   ;;  %p2021_p3 = pnand %p2020_p10, %p2298_p5 }
  0x93   : > { %v1751_v41 = vld [vmem:[#allocation7 + $0x44] ss:$8 sps:$4 sm:$0xff]   ;;  %v366_v43 = vpack.c.bf16 %v357_v40, %v356_v39  ;;  %v1749_v44 = vld [vmem:[#allocation7 + $0x40] ss:$8 sps:$4 sm:$0xff]   ;;  %v350_v47 = vld [vmem:[%s2355_s17 + $0x30] sm:$0xff] }
  0x94   : > { %v351_v48 = vld [vmem:[%s2355_s17 + $0x38] sm:$0xff]  ;;  %v358_v49 = vld [vmem:[%s2355_s17 + $0x70] sm:$0xff]  ;;  %v1757_v51 = vld [vmem:[#allocation7 + $0x64] ss:$8 sps:$4 sm:$0xff]   ;;  %p2022_p7 = pneg %p2021_p3 }
  0x95   : > { %483 = vmatpush1.bf16.msra.mxu0 %v1724_v8  ;;  %1624 = vmatpush1.bf16.msra.mxu1 %v1724_v8  ;;  %v359_v50 = vld [vmem:[%s2355_s17 + $0x78] sm:$0xff]  ;;  %v363_v52 = vpack.c.bf16 %v351_v48, %v350_v47  ;;  %v1755_v54 = vld [vmem:[#allocation7 + $0x60] ss:$8 sps:$4 sm:$0xff]   ;;  %v1765_v61 = vld [vmem:[#allocation8 + $0x50] sm:$0xff]   ;;  %s2104_s17 = smov [#allocation10]  }
  0x96   : > { %484 = vmatprep.subr.bf16.mxu0 %v1725_v9  ;;  %1617 = vmatprep.subr.bf16.mxu1 %v1725_v9  ;;  %v367_v53 = vpack.c.bf16 %v359_v50, %v358_v49  ;;  %v1760_v55 = vld [vmem:[#allocation7 + $0x74] ss:$8 sps:$4 sm:$0xff]   ;;  %v1758_v56 = vld [vmem:[#allocation7 + $0x70] ss:$8 sps:$4 sm:$0xff]   ;;  %v1761_v57 = vld [vmem:[#allocation8 + $0x40] sm:$0xff]   ;;  %v386_v9 = vlaneseq  ;;  %s2023_s30 = sshll.u32 %s2104_s17, 4  ;;  %s2024_s30 = int_to_ptr.vmem [resolvable:$false] %s2023_s30 }
  0x97   : > { %v1762_v58 = vld [vmem:[#allocation8] sm:$0xff]   ;;  %v1763_v59 = vld [vmem:[#allocation8 + $0x48] sm:$0xff]   ;;  %v1766_v62 = vld [vmem:[#allocation8 + $0x10] sm:$0xff]   ;;  %s2025_s9 = scalar_lea.vmem %s2024_s30, 4096  ;;  %p2026_p12 = scmp.lt.s32.totalorder %s2756_s29, %s2024_s30 }
  0x98   : > { %v1764_v60 = vld [vmem:[#allocation8 + $0x8] sm:$0xff]   ;;  %v1767_v63 = vld [vmem:[#allocation8 + $0x58] sm:$0xff]   ;;  %v1769_v2 = vld [vmem:[#allocation8 + $0x60] sm:$0xff]   ;;  %p2027_p1 = scmp.lt.s32.totalorder %s2025_s9, %s2019_s22 }
  0x99   : > { %485 = vmatpush1.bf16.msra.mxu0 %v1727_v10  ;;  %1625 = vmatpush1.bf16.msra.mxu1 %v1727_v10  ;;  %v1768_v1 = vld [vmem:[#allocation8 + $0x18] sm:$0xff]   ;;  %v1770_v3 = vld [vmem:[#allocation8 + $0x20] sm:$0xff]   ;;  %v1772_v4 = vld [vmem:[#allocation8 + $0x28] sm:$0xff]   ;;  %v2409_v10 = vshrl.u32 %v386_v9, 7 }
  0x9a   : > { %486 = vmatprep.subr.bf16.mxu0 %v1728_v11  ;;  %1618 = vmatprep.subr.bf16.mxu1 %v1728_v11  ;;  %v1773_v5 = vld [vmem:[#allocation8 + $0x70] sm:$0xff]   ;;  %v1775_v7 = vld [vmem:[#allocation8 + $0x78] sm:$0xff]   ;;  %p2028_p2 = por %p2027_p1, %p2026_p12 }
  0x9b   : > { %v1774_v6 = vld [vmem:[#allocation8 + $0x30] sm:$0xff]   ;;  %v1776_v8 = vld [vmem:[#allocation8 + $0x38] sm:$0xff]   ;;  %v388_v11 = vsub.s32 0, %v2409_v10 }
  0x9c   : > { %p2029_p4 = pnand %p2028_p2, %p2022_p7 }
  0x9d   : > { %487 = vmatpush1.bf16.msra.mxu0 %v1730_v12  ;;  %1626 = vmatpush1.bf16.msra.mxu1 %v1730_v12  ;;  %v384_v12 = vld [vmem:[%s2805_s2] sm:$0x3] }
  0x9e   : > { %488 = vmatprep.subr.bf16.mxu0 %v1731_v13  ;;  %1619 = vmatprep.subr.bf16.mxu1 %v1731_v13  ;;  %v392_v13 = vsub.s32 1, %v2409_v10 }
  0xa1   : > { %489 = vmatpush1.bf16.msra.mxu0 %v1733_v14  ;;  %1627 = vmatpush1.bf16.msra.mxu1 %v1733_v14  ;;  %v2418_v14 = vrot.slane %v384_v12, %v388_v11 }
  0xa2   : > { %490 = vmatprep.subr.bf16.mxu0 %v1734_v15  ;;  %1620 = vmatprep.subr.bf16.mxu1 %v1734_v15  ;;  %v2422_v15 = vrot.slane %v384_v12, %v392_v13 }
  0xa5   : > { %491 = vmatpush1.bf16.msra.mxu0 %v1736_v16  ;;  %1628 = vmatpush1.bf16.msra.mxu1 %v1736_v16 }
  0xa6   : > { %697 = vmatprep.subr.bf16.mxu1 %v1739_v21  ;;  %1549 = vmatprep.subr.bf16.mxu0 %v1761_v57 }
  0xa8   : > { %509 = vmatmul.mubr.bf16.vlgmr.msra.gmra.mrb[0].mxu0 %v2375_v23  ;;  %549 = vmatmul.mubr.bf16.vlgmr.msra.gmra.mrb[0].mxu1 %v2377_v24 }
  0xa9   : > { %698 = vmatpush1.bf16.msra.mxu1 %v1737_v22  ;;  %518 = vmatprep.mubr.bf16.mxu0 %v2103_v0 }
  0xaa   : > { %699 = vmatprep.subr.bf16.mxu1 %v1742_v25  ;;  %558 = vmatprep.mubr.bf16.mxu1 %v2103_v0 }
  0xab   : > { %1550 = vmatpush3.bf16.msra.mxu0 %v1762_v58 }
  0xac   : > { %1551 = vmatprep.subr.bf16.mxu0 %v1763_v59 }
  0xad   : > { %700 = vmatpush1.bf16.msra.mxu1 %v1740_v26 }
  0xae   : > { %701 = vmatprep.subr.bf16.mxu1 %v1745_v31 }
  0xaf   : > { %1552 = vmatpush3.bf16.msra.mxu0 %v1764_v60 }
  0xb0   : > { %519 = vmatmul.mubr.bf16.gmra.mrb[4].mxu0 %v361_v32  ;;  %559 = vmatmul.mubr.bf16.gmra.mrb[4].mxu1 %v365_v33 }
  0xb1   : > { %702 = vmatpush1.bf16.msra.mxu1 %v1743_v34  ;;  %528 = vmatprep.mubr.bf16.mxu0 %v2103_v0 }
  0xb2   : > { %703 = vmatprep.subr.bf16.mxu1 %v1748_v35  ;;  %568 = vmatprep.mubr.bf16.mxu1 %v2103_v0 }
  0xb3   : > { %1553 = vmatprep.subr.bf16.mxu0 %v1765_v61 }
  0xb4   : > { %1554 = vmatpush3.bf16.msra.mxu0 %v1766_v62 }
  0xb5   : > { %704 = vmatpush1.bf16.msra.mxu1 %v1746_v36  ;;  %1555 = vmatprep.subr.bf16.mxu0 %v1767_v63 }
  0xb6   : > { %705 = vmatprep.subr.bf16.mxu1 %v1751_v41 }
  0xb8   : > { %529 = vmatmul.mubr.bf16.gmra.mrb[8].mxu0 %v362_v42  ;;  %569 = vmatmul.mubr.bf16.gmra.mrb[8].mxu1 %v366_v43 }
  0xb9   : > { %706 = vmatpush1.bf16.msra.mxu1 %v1749_v44  ;;  %538 = vmatprep.mubr.bf16.mxu0 %v2103_v0 }
  0xba   : > { %707 = vmatprep.subr.bf16.mxu1 %v1754_v45  ;;  %578 = vmatprep.mubr.bf16.mxu1 %v2103_v0 }
  0xbb   : > { %1556 = vmatpush3.bf16.msra.mxu0 %v1768_v1 }
  0xbc   : > { %1557 = vmatprep.subr.bf16.mxu0 %v1769_v2 }
  0xbd   : > { %708 = vmatpush1.bf16.msra.mxu1 %v1752_v46 }
  0xbe   : > { %709 = vmatprep.subr.bf16.mxu1 %v1757_v51 }
  0xbf   : > { %1558 = vmatpush3.bf16.msra.mxu0 %v1770_v3 }
  0xc0   : > { %539 = vmatmul.mubr.bf16.gmra.mrb[12].mxu0 %v363_v52  ;;  %579 = vmatmul.mubr.bf16.gmra.mrb[12].mxu1 %v367_v53 }
  0xc1   : > { %710 = vmatpush1.bf16.msra.mxu1 %v1755_v54  ;;  %729 = vmatprep.mubr.bf16.mxu1 %v2103_v0 }
  0xc2   : > { %711 = vmatprep.subr.bf16.mxu1 %v1760_v55 }
  0xc5   : > { %712 = vmatpush1.bf16.msra.mxu1 %v1758_v56 }
  0xc8   : > { %730 = vmatmul.mubr.bf16.vlgmr.msra.gmra.mrb[16].mxu1 %v2375_v23 }
  0xc9   : > { %739 = vmatprep.mubr.bf16.mxu1 %v2103_v0 }
  0xd0   : > { %740 = vmatmul.mubr.bf16.gmra.mrb[20].mxu1 %v361_v32 }
  0xd1   : > { %749 = vmatprep.mubr.bf16.mxu1 %v2103_v0 }
  0xd8   : > { %750 = vmatmul.mubr.bf16.gmra.mrb[24].mxu1 %v362_v42 }
  0xd9   : > { %759 = vmatprep.mubr.bf16.mxu1 %v2103_v0 }
  0xe0   : > { %760 = vmatmul.mubr.bf16.gmra.mrb[28].mxu1 %v363_v52 }
  0xe1   : > { %769 = vmatprep.mubr.bf16.mxu1 %v2103_v0 }
  0xe8   : > { %770 = vmatmul.mubr.bf16.gmra.mrb[32].mxu1 %v2377_v24 }
  0xe9   : > { %779 = vmatprep.mubr.bf16.mxu1 %v2103_v0 }
  0xf0   : > { %780 = vmatmul.mubr.bf16.gmra.mrb[36].mxu1 %v365_v33 }
  0xf1   : > { %789 = vmatprep.mubr.bf16.mxu1 %v2103_v0 }
  0xf8   : > { %790 = vmatmul.mubr.bf16.gmra.mrb[40].mxu1 %v366_v43 }
  0xf9   : > { %799 = vmatprep.mubr.bf16.mxu1 %v2103_v0  ;;  %v1771_v0 = vld [vmem:[#allocation8 + $0x68] sm:$0xff]  }
  0xfa   : > { %1559 = vmatprep.subr.bf16.mxu0 %v1771_v0 }
  0xfb   : > { %1560 = vmatpush3.bf16.msra.mxu0 %v1772_v4 }
  0xfc   : > { %1561 = vmatprep.subr.bf16.mxu0 %v1773_v5 }
  0xff   : > { %1562 = vmatpush3.bf16.msra.mxu0 %v1774_v6 }
 0x100   : > { %800 = vmatmul.mubr.bf16.gmra.mrb[44].mxu1 %v367_v53  ;;  %1563 = vmatprep.subr.bf16.mxu0 %v1775_v7 }
 0x103   : > { %1564 = vmatpush3.bf16.msra.mxu0 %v1776_v8 }
 0x17b   : > { %v510_v16 = vpop.f32.mrb[0].mxu0  ;;  %v550_v17 = vpop.f32.mrb[0].mxu1 }
 0x17c   : > { %v2425_v18 = vadd.f32 %v510_v16, %v2418_v14  ;;  %v2428_v19 = vadd.f32 %v550_v17, %v2418_v14  ;;  %v512_v20 = vpop.f32.mrb[1].mxu0  ;;  %v552_v21 = vpop.f32.mrb[1].mxu1 }
 0x17d   : > { %v2431_v22 = vadd.f32 %v512_v20, %v2422_v15  ;;  %v2434_v23 = vadd.f32 %v552_v21, %v2422_v15  ;;  %v514_v24 = vpop.f32.mrb[2].mxu0  ;;  %v554_v25 = vpop.f32.mrb[2].mxu1 }
 0x17e   : > { %v1493_v26 = vmul.f32 -1.442695, %v2425_v18  ;;  %v2438_v27 = vadd.f32 %v514_v24, %v2418_v14  ;;  %v516_v28 = vpop.f32.mrb[3].mxu0  ;;  %v556_v29 = vpop.f32.mrb[3].mxu1  ;;  %v1509_v30 = vmul.f32 -1.442695, %v2428_v19  ;;  %v2448_v35 = vadd.f32 %v554_v25, %v2418_v14 }
 0x17f   : > { %v1494_v31 = vmul.f32 -1.442695, %v2431_v22  ;;  %v2443_v32 = vadd.f32 %v516_v28, %v2422_v15  ;;  %v1510_v34 = vmul.f32 -1.442695, %v2434_v23  ;;  %v2459_v44 = vadd.f32 %v556_v29, %v2422_v15 }
 0x180   : > { %1777 = vpow2.f32 %v1493_v26  ;;  %v1495_v33 = vmul.f32 -1.442695, %v2438_v27  ;;  %v1511_v43 = vmul.f32 -1.442695, %v2448_v35 }
 0x181   : > { %1779 = vpow2.f32 %v1494_v31  ;;  %v1496_v36 = vmul.f32 -1.442695, %v2443_v32  ;;  %v1512_v55 = vmul.f32 -1.442695, %v2459_v44 }
 0x182   : > { %1781 = vpow2.f32 %v1509_v30 }
 0x183   : > { %v520_v37 = vpop.f32.mrb[4].mxu0  ;;  %v560_v38 = vpop.f32.mrb[4].mxu1  ;;  %1783 = vpow2.f32 %v1495_v33 }
 0x184   : > { %v2452_v39 = vadd.f32 %v520_v37, %v2418_v14  ;;  %v2455_v40 = vadd.f32 %v560_v38, %v2418_v14  ;;  %v522_v41 = vpop.f32.mrb[5].mxu0  ;;  %v562_v42 = vpop.f32.mrb[5].mxu1  ;;  %1785 = vpow2.f32 %v1510_v34 }
 0x185   : > { %v2462_v45 = vadd.f32 %v522_v41, %v2422_v15  ;;  %v524_v46 = vpop.f32.mrb[6].mxu0  ;;  %v564_v47 = vpop.f32.mrb[6].mxu1  ;;  %1787 = vpow2.f32 %v1496_v36  ;;  %v2478_v58 = vadd.f32 %v562_v42, %v2422_v15 }
 0x186   : > { %v1497_v48 = vmul.f32 -1.442695, %v2452_v39  ;;  %v2466_v49 = vadd.f32 %v524_v46, %v2418_v14  ;;  %v526_v50 = vpop.f32.mrb[7].mxu0  ;;  %v2468_v51 = vpop.f32.mrb[7].mxu1  ;;  %v2472_v53 = vadd.f32 %v564_v47, %v2418_v14  ;;  %v1513_v57 = vmul.f32 -1.442695, %v2455_v40 }
 0x187   : > { %v1498_v52 = vmul.f32 -1.442695, %v2462_v45  ;;  %v1514_v8 = vmul.f32 -1.442695, %v2478_v58  ;;  %v2494_v30 = vadd.f32 %v526_v50, %v2422_v15 }
 0x188   : > { %1789 = vpow2.f32 %v1497_v48  ;;  %v1499_v54 = vmul.f32 -1.442695, %v2466_v49  ;;  %v605_v48 = vld [vmem:[%s2807_s4] sm:$0x3] }
 0x189   : > { %1791 = vpow2.f32 %v1511_v43 }
 0x18a   : > { %v1778_v56 = vpop.eup %1777  ;;  %1793 = vpow2.f32 %v1498_v52 }
 0x18b   : > { %v906_v59 = vadd.f32 1.0, %v1778_v56  ;;  %v530_v60 = vpop.f32.mrb[8].mxu0  ;;  %v570_v61 = vpop.f32.mrb[8].mxu1  ;;  %1795 = vpow2.f32 %v1499_v54  ;;  %v1500_v54 = vmul.f32 -1.442695, %v2494_v30 }
 0x18c   : > { %v1780_v62 = vpop.eup %1779  ;;  %v2481_v63 = vadd.f32 %v570_v61, %v2418_v14  ;;  %v532_v1 = vpop.f32.mrb[9].mxu0  ;;  %1797 = vpow2.f32 %v1512_v55  ;;  %v2499_v42 = vadd.f32 %v530_v60, %v2418_v14 }
 0x18d   : > { %v572_v2 = vpop.f32.mrb[9].mxu1  ;;  %v1782_v3 = vpop.eup %1781  ;;  %v907_v0 = vadd.f32 1.0, %v1780_v62  ;;  %1799 = vpow2.f32 %v1513_v57  ;;  %v2516_v61 = vadd.f32 %v532_v1, %v2422_v15 }
 0x18e   : > { %v2484_v4 = vadd.f32 %v572_v2, %v2422_v15  ;;  %v534_v5 = vpop.f32.mrb[10].mxu0  ;;  %v574_v6 = vpop.f32.mrb[10].mxu1  ;;  %1801 = vrcp.f32 %v906_v59  ;;  %v922_v24 = vadd.f32 1.0, %v1782_v3 }
 0x18f   : > { %v1784_v7 = vpop.eup %1783  ;;  %v536_v9 = vpop.f32.mrb[11].mxu0  ;;  %1803 = vrcp.f32 %v907_v0  ;;  %v2488_v21 = vadd.f32 %v574_v6, %v2418_v14  ;;  %v2519_v62 = vadd.f32 %v534_v5, %v2418_v14  ;;  %v2526_v6 = vrot.slane %v605_v48, %v388_v11 }
 0x190   : > { %v1786_v12 = vpop.eup %1785  ;;  %v908_v16 = vadd.f32 1.0, %v1784_v7  ;;  %v576_v17 = vpop.f32.mrb[11].mxu1  ;;  %v2522_v0 = vadd.f32 %v536_v9, %v2422_v15  ;;  %v2534_v5 = vrot.slane %v605_v48, %v392_v13  ;;  %v1515_v9 = vmul.f32 -1.442695, %v2472_v53 }
 0x191   : > { %v1788_v20 = vpop.eup %1787  ;;  %v2491_v26 = vadd.f32 %v576_v17, %v2422_v15  ;;  %v923_v29 = vadd.f32 1.0, %v1786_v12  ;;  %v1503_v10 = vmul.f32 -1.442695, %v2519_v62 }
 0x192   : > { %1805 = vrcp.f32 %v908_v16  ;;  %v909_v25 = vadd.f32 1.0, %v1788_v20  ;;  %v1790_v28 = vpop.eup %1789  ;;  %v2542_v20 = vadd.f32 %v2468_v51, %v2422_v15 }
 0x193   : > { %1807 = vpow2.f32 %v1514_v8  ;;  %v1792_v31 = vpop.eup %1791  ;;  %v910_v33 = vadd.f32 1.0, %v1790_v28  ;;  %v540_v34 = vpop.f32.mrb[12].mxu0  ;;  %v1501_v8 = vmul.f32 -1.442695, %v2499_v42 }
 0x194   : > { %1809 = vrcp.f32 %v909_v25  ;;  %v1794_v36 = vpop.eup %1793  ;;  %v580_v37 = vpop.f32.mrb[12].mxu1  ;;  %v924_v52 = vadd.f32 1.0, %v1792_v31  ;;  %v1504_v31 = vmul.f32 -1.442695, %v2522_v0  ;;  %v2551_v51 = vadd.f32 %v540_v34, %v2418_v14 }
 0x195   : > { %v2496_v38 = vpop.f32.mrb[13].mxu0  ;;  %1811 = vrcp.f32 %v922_v24  ;;  %v911_v41 = vadd.f32 1.0, %v1794_v36  ;;  %v2502_v43 = vadd.f32 %v580_v37, %v2418_v14  ;;  %v582_v46 = vpop.f32.mrb[13].mxu1  ;;  %v1502_v24 = vmul.f32 -1.442695, %v2516_v61 }
 0x196   : > { %v2504_v47 = vpop.f32.mrb[14].mxu0  ;;  %v1796_v50 = vpop.eup %1795  ;;  %1813 = vrcp.f32 %v923_v29  ;;  %v2511_v55 = vadd.f32 %v582_v46, %v2422_v15 }
 0x197   : > { %v584_v56 = vpop.f32.mrb[14].mxu1  ;;  %v2513_v57 = vpop.f32.mrb[15].mxu0  ;;  %1815 = vrcp.f32 %v910_v33  ;;  %v912_v60 = vadd.f32 1.0, %v1796_v50 }
 0x198   : > { %v1798_v59 = vpop.eup %1797  ;;  %v586_v2 = vpop.f32.mrb[15].mxu1  ;;  %1817 = vrcp.f32 %v911_v41  ;;  %v2530_v1 = vadd.f32 %v584_v56, %v2418_v14 }
 0x199   : > { %v1800_v3 = vpop.eup %1799  ;;  %1819 = vrcp.f32 %v912_v60  ;;  %v925_v16 = vadd.f32 1.0, %v1798_v59  ;;  %v2538_v17 = vadd.f32 %v586_v2, %v2422_v15 }
 0x19a   : > { %v1802_v7 = vpop.eup %1801  ;;  %1821 = vrcp.f32 %v924_v52  ;;  %v926_v29 = vadd.f32 1.0, %v1800_v3 }
 0x19b   : > { %v1804_v12 = vpop.eup %1803  ;;  %1823 = vpow2.f32 %v1500_v54  ;;  %v731_v13 = vpop.f32.mrb[16].mxu1  ;;  %v1002_v28 = vmul.f32 %v1802_v7, %v2425_v18 }
 0x19c   : > { %v1806_v11 = vpop.eup %1805  ;;  %v732_v33 = vadd.f32 %v731_v13, %v2526_v6  ;;  %v733_v36 = vpop.f32.mrb[17].mxu1  ;;  %v1003_v41 = vmul.f32 %v1804_v12, %v2431_v22  ;;  %1825 = vpow2.f32 %v1501_v8 }
 0x19d   : > { %v1808_v25 = vpop.eup %1807  ;;  %v734_v46 = vadd.f32 %v733_v36, %v2534_v5  ;;  %v735_v48 = vpop.f32.mrb[18].mxu1  ;;  %v1004_v50 = vmul.f32 %v1806_v11, %v2438_v27  ;;  %1827 = vrcp.f32 %v925_v16  ;;  %v1505_v27 = vmul.f32 -1.442695, %v2551_v51 }
 0x19e   : > { %v1810_v37 = vpop.eup %1809  ;;  %v1034_v18 = vmul.f32 %v1002_v28, %v732_v33  ;;  %v736_v52 = vadd.f32 %v735_v48, %v2526_v6  ;;  %v737_v54 = vpop.f32.mrb[19].mxu1  ;;  %1829 = vpow2.f32 %v1502_v24  ;;  %v927_v2 = vadd.f32 1.0, %v1808_v25 }
 0x19f   : > { %v2556_v56 = vpop.eup %1811  ;;  %v1005_v59 = vmul.f32 %v1810_v37, %v2443_v32  ;;  %v1035_v22 = vmul.f32 %v1003_v41, %v734_v46  ;;  %v738_v60 = vadd.f32 %v737_v54, %v2534_v5  ;;  %1831 = vrcp.f32 %v926_v29 }
 0x1a0   : > { %v2560_v34 = vpop.eup %1813  ;;  %v1036_v3 = vmul.f32 %v1004_v50, %v736_v52  ;;  %1833 = vpow2.f32 %v1503_v10  ;;  %v1516_v32 = vmul.f32 -1.442695, %v2542_v20 }
 0x1a1   : > { %v1816_v7 = vpop.eup %1815  ;;  %v1037_v8 = vmul.f32 %v1005_v59, %v738_v60  ;;  %1835 = vpow2.f32 %v1515_v9  ;;  %v1517_v9 = vmul.f32 -1.442695, %v2481_v63  ;;  %v1519_v60 = vmul.f32 -1.442695, %v2488_v21 }
 0x1a2   : > { %v1818_v12 = vpop.eup %1817  ;;  %v1066_v16 = vpack.c.bf16 %v1036_v3, %v1034_v18  ;;  %1837 = vpow2.f32 %v1504_v31  ;;  %v1006_v29 = vmul.f32 %v1816_v7, %v2452_v39 }
 0x1a3   : > { %v1820_v11 = vpop.eup %1819  ;;  %v741_v24 = vpop.f32.mrb[20].mxu1  ;;  %v1067_v13 = vpack.c.bf16 %v1037_v8, %v1035_v22  ;;  %1839 = vrcp.f32 %v927_v2  ;;  %v1007_v36 = vmul.f32 %v1818_v12, %v2462_v45  ;;  %v1518_v45 = vmul.f32 -1.442695, %v2484_v4 }
 0x1a4   : > { %v2564_v28 = vpop.eup %1821  ;;  %v742_v25 = vadd.f32 %v741_v24, %v2526_v6  ;;  %v743_v10 = vpop.f32.mrb[21].mxu1  ;;  %1841 = vpow2.f32 %v1505_v27  ;;  %v1008_v31 = vmul.f32 %v1820_v11, %v2466_v49  ;;  %v1520_v8 = vmul.f32 -1.442695, %v2491_v26 }
 0x1a5   : > { %v1824_v33 = vpop.eup %1823  ;;  %v744_v37 = vadd.f32 %v743_v10, %v2534_v5  ;;  %v745_v41 = vpop.f32.mrb[22].mxu1  ;;  %1249 = vmatprep.mubr.bf16.mxu0 %v1067_v13  ;;  %1843 = vpow2.f32 %v1516_v32  ;;  %v2590_v32 = vadd.f32 %v2496_v38, %v2422_v15 }
 0x1a6   : > { %v913_v46 = vadd.f32 1.0, %v1824_v33  ;;  %v2572_v48 = vmul.f32 %v1006_v29, %v742_v25  ;;  %v746_v39 = vadd.f32 %v745_v41, %v2526_v6  ;;  %v747_v50 = vpop.f32.mrb[23].mxu1  ;;  %1250 = vmatmul.mubr.bf16.vlgmr.msra.gmra.mrb[16].mxu0 %v1066_v16  ;;  %v1826_v18 = vpop.eup %1825  ;;  %v1521_v29 = vmul.f32 -1.442695, %v2502_v43 }
 0x1a7   : > { %v2576_v52 = vmul.f32 %v1007_v36, %v744_v37  ;;  %v2578_v54 = vpop.eup %1827  ;;  %v914_v59 = vadd.f32 1.0, %v1826_v18  ;;  %v2597_v36 = vadd.f32 %v2504_v47, %v2418_v14  ;;  %v1522_v18 = vmul.f32 -1.442695, %v2511_v55 }
 0x1a8   : > { %1845 = vrcp.f32 %v913_v46  ;;  %v2580_v22 = vmul.f32 %v1008_v31, %v746_v39  ;;  %v1830_v49 = vpop.eup %1829  ;;  %v1506_v31 = vmul.f32 -1.442695, %v2590_v32  ;;  %v2602_v46 = vadd.f32 %v2513_v57, %v2422_v15 }
 0x1a9   : > { %1847 = vpow2.f32 %v1517_v9  ;;  %v2583_v2 = vpop.eup %1831  ;;  %v915_v3 = vadd.f32 1.0, %v1830_v49  ;;  %v1507_v47 = vmul.f32 -1.442695, %v2597_v36 }
 0x1aa   : > { %1849 = vrcp.f32 %v914_v59  ;;  %v1068_v7 = vpack.c.bf16 %v2580_v22, %v2572_v48  ;;  %v1834_v27 = vpop.eup %1833 }
 0x1ab   : > { %1851 = vpow2.f32 %v1518_v45  ;;  %v751_v12 = vpop.f32.mrb[24].mxu1  ;;  %v1836_v16 = vpop.eup %1835  ;;  %v916_v11 = vadd.f32 1.0, %v1834_v27  ;;  %v748_v45 = vadd.f32 %v747_v50, %v2534_v5  ;;  %v1508_v27 = vmul.f32 -1.442695, %v2602_v46 }
 0x1ac   : > { %1853 = vrcp.f32 %v915_v3  ;;  %v753_v24 = vpop.f32.mrb[25].mxu1  ;;  %v1838_v13 = vpop.eup %1837  ;;  %v928_v41 = vadd.f32 1.0, %v1836_v16  ;;  %v752_v3 = vadd.f32 %v751_v12, %v2526_v6 }
 0x1ad   : > { %1855 = vpow2.f32 %v1519_v60  ;;  %v755_v25 = vpop.f32.mrb[26].mxu1  ;;  %v2593_v10 = vpop.eup %1839  ;;  %v917_v33 = vadd.f32 1.0, %v1838_v13  ;;  %v1523_v60 = vmul.f32 -1.442695, %v2530_v1 }
 0x1ae   : > { %1857 = vrcp.f32 %v916_v11  ;;  %v757_v9 = vpop.f32.mrb[27].mxu1  ;;  %v1842_v37 = vpop.eup %1841 }
 0x1af   : > { %1859 = vpow2.f32 %v1520_v8  ;;  %v918_v38 = vadd.f32 1.0, %v1842_v37  ;;  %v1844_v39 = vpop.eup %1843  ;;  %v1524_v8 = vmul.f32 -1.442695, %v2538_v17  ;;  %v756_v37 = vadd.f32 %v755_v25, %v2526_v6 }
 0x1b0   : > { %1861 = vrcp.f32 %v917_v33  ;;  %v929_v12 = vadd.f32 1.0, %v1844_v39  ;;  %v758_v25 = vadd.f32 %v757_v9, %v2534_v5 }
 0x1b1   : > { %1863 = vpow2.f32 %v1521_v29 }
 0x1b2   : > { %v1846_v14 = vpop.eup %1845  ;;  %1865 = vrcp.f32 %v918_v38 }
 0x1b3   : > { %v1848_v59 = vpop.eup %1847  ;;  %1867 = vrcp.f32 %v928_v41  ;;  %v1009_v49 = vmul.f32 %v1846_v14, %v2494_v30  ;;  %v761_v15 = vpop.f32.mrb[28].mxu1  ;;  %v754_v30 = vadd.f32 %v753_v24, %v2534_v5 }
 0x1b4   : > { %v1850_v57 = vpop.eup %1849  ;;  %1869 = vpow2.f32 %v1506_v31  ;;  %v2612_v50 = vpop.f32.mrb[29].mxu1 }
 0x1b5   : > { %v1852_v16 = vpop.eup %1851  ;;  %v1010_v11 = vmul.f32 %v1850_v57, %v2499_v42  ;;  %1871 = vpow2.f32 %v1522_v18  ;;  %v1041_v13 = vmul.f32 %v1009_v49, %v748_v45  ;;  %v2616_v29 = vpop.f32.mrb[30].mxu1  ;;  %v930_v45 = vadd.f32 1.0, %v1848_v59 }
 0x1b6   : > { %v1854_v33 = vpop.eup %1853  ;;  %1873 = vpow2.f32 %v1507_v47  ;;  %v2619_v41 = vpop.f32.mrb[31].mxu1  ;;  %v1018_v57 = vmul.f32 %v2556_v56, %v2428_v19  ;;  %v1019_v59 = vmul.f32 %v2560_v34, %v2434_v23  ;;  %v1020_v19 = vmul.f32 %v2564_v28, %v2448_v35 }
 0x1b7   : > { %v1856_v38 = vpop.eup %1855  ;;  %v1011_v31 = vmul.f32 %v1854_v33, %v2516_v61  ;;  %1875 = vpow2.f32 %v1523_v60  ;;  %v1042_v14 = vmul.f32 %v1010_v11, %v752_v3  ;;  %v1069_v42 = vpack.c.bf16 %v1041_v13, %v2576_v52 }
 0x1b8   : > { %v1858_v18 = vpop.eup %1857  ;;  %1877 = vpow2.f32 %v1508_v27  ;;  %v931_v61 = vadd.f32 1.0, %v1852_v16  ;;  %v762_v3 = vadd.f32 %v761_v15, %v2526_v6  ;;  %v932_v56 = vadd.f32 1.0, %v1856_v38 }
 0x1b9   : > { %v1860_v24 = vpop.eup %1859  ;;  %v1012_v49 = vmul.f32 %v1858_v18, %v2519_v62  ;;  %1879 = vpow2.f32 %v1524_v8  ;;  %v1043_v39 = vmul.f32 %v1011_v31, %v754_v30  ;;  %1257 = vmatprep.mubr.bf16.mxu0 %v1069_v42  ;;  %v1021_v31 = vmul.f32 %v2578_v54, %v2459_v44 }
 0x1ba   : > { %v1862_v47 = vpop.eup %1861  ;;  %1881 = vrcp.f32 %v929_v12  ;;  %1258 = vmatmul.mubr.bf16.gmra.mrb[20].mxu0 %v1068_v7  ;;  %v933_v15 = vadd.f32 1.0, %v1860_v24 }
 0x1bb   : > { %v1864_v52 = vpop.eup %1863  ;;  %v1013_v62 = vmul.f32 %v1862_v47, %v2522_v0  ;;  %v1044_v60 = vmul.f32 %v1012_v49, %v756_v37  ;;  %v771_v9 = vpop.f32.mrb[32].mxu1  ;;  %1883 = vrcp.f32 %v930_v45 }
 0x1bc   : > { %v1866_v27 = vpop.eup %1865  ;;  %v772_v8 = vadd.f32 %v771_v9, %v2526_v6  ;;  %v773_v48 = vpop.f32.mrb[33].mxu1  ;;  %1885 = vrcp.f32 %v931_v61  ;;  %v934_v47 = vadd.f32 1.0, %v1864_v52  ;;  %v1022_v61 = vmul.f32 %v2583_v2, %v2455_v40 }
 0x1bd   : > { %v1868_v22 = vpop.eup %1867  ;;  %v1014_v7 = vmul.f32 %v1866_v27, %v2551_v51  ;;  %v1045_v16 = vmul.f32 %v1013_v62, %v758_v25  ;;  %v1070_v23 = vpack.c.bf16 %v1044_v60, %v1042_v14  ;;  %v774_v0 = vadd.f32 %v773_v48, %v2534_v5  ;;  %v775_v34 = vpop.f32.mrb[34].mxu1 }
 0x1be   : > { %v1870_v11 = vpop.eup %1869  ;;  %v2639_v13 = vmul.f32 %v1018_v57, %v772_v8  ;;  %v776_v35 = vadd.f32 %v775_v34, %v2526_v6  ;;  %v777_v28 = vpop.f32.mrb[35].mxu1  ;;  %1887 = vrcp.f32 %v932_v56  ;;  %v1023_v9 = vmul.f32 %v2593_v10, %v2478_v58 }
 0x1bf   : > { %v1872_v30 = vpop.eup %1871  ;;  %v919_v33 = vadd.f32 1.0, %v1870_v11  ;;  %v2642_v12 = vmul.f32 %v1014_v7, %v762_v3  ;;  %v1071_v37 = vpack.c.bf16 %v1045_v16, %v1043_v39  ;;  %v2644_v38 = vmul.f32 %v1019_v59, %v774_v0 }
 0x1c0   : > { %v1874_v51 = vpop.eup %1873  ;;  %v2648_v14 = vmul.f32 %v1020_v19, %v776_v35  ;;  %v778_v42 = vadd.f32 %v777_v28, %v2534_v5  ;;  %v935_v59 = vadd.f32 1.0, %v1872_v30  ;;  %v1024_v8 = vmul.f32 %v1868_v22, %v2472_v53 }
 0x1c1   : > { %v1876_v18 = vpop.eup %1875  ;;  %1889 = vrcp.f32 %v919_v33  ;;  %v920_v45 = vadd.f32 1.0, %v1874_v51  ;;  %1265 = vmatprep.mubr.bf16.mxu0 %v1071_v37  ;;  %v764_v22 = vadd.f32 %v2612_v50, %v2534_v5  ;;  %v766_v37 = vadd.f32 %v2616_v29, %v2526_v6 }
 0x1c2   : > { %v1878_v24 = vpop.eup %1877  ;;  %1891 = vrcp.f32 %v933_v15  ;;  %1266 = vmatmul.mubr.bf16.gmra.mrb[24].mxu0 %v1070_v23  ;;  %v2651_v49 = vmul.f32 %v1021_v31, %v778_v42  ;;  %v1074_v39 = vpack.c.bf16 %v2648_v14, %v2639_v13  ;;  %v936_v27 = vadd.f32 1.0, %v1876_v18 }
 0x1c3   : > { %v1880_v25 = vpop.eup %1879  ;;  %1893 = vrcp.f32 %v920_v45  ;;  %v921_v44 = vadd.f32 1.0, %v1878_v24  ;;  %v781_v54 = vpop.f32.mrb[36].mxu1  ;;  %v768_v45 = vadd.f32 %v2619_v41, %v2534_v5 }
 0x1c4   : > { %v1882_v57 = vpop.eup %1881  ;;  %v782_v62 = vadd.f32 %v781_v54, %v2526_v6  ;;  %v783_v60 = vpop.f32.mrb[37].mxu1  ;;  %v1075_v3 = vpack.c.bf16 %v2651_v49, %v2644_v38  ;;  %v937_v48 = vadd.f32 1.0, %v1880_v25 }
 0x1c5   : > { %1895 = vrcp.f32 %v921_v44  ;;  %v784_v52 = vadd.f32 %v783_v60, %v2534_v5  ;;  %v785_v19 = vpop.f32.mrb[38].mxu1  ;;  %v1884_v56 = vpop.eup %1883  ;;  %v1025_v16 = vmul.f32 %v1882_v57, %v2542_v20 }
 0x1c6   : > { %v2664_v40 = vmul.f32 %v1022_v61, %v782_v62  ;;  %v786_v2 = vadd.f32 %v785_v19, %v2526_v6  ;;  %v787_v7 = vpop.f32.mrb[39].mxu1  ;;  %1897 = vrcp.f32 %v934_v47  ;;  %v1886_v10 = vpop.eup %1885  ;;  %v1026_v30 = vmul.f32 %v1884_v56, %v2481_v63 }
 0x1c7   : > { %v2668_v23 = vmul.f32 %v1023_v9, %v784_v52  ;;  %v788_v58 = vadd.f32 %v787_v7, %v2534_v5  ;;  %1899 = vrcp.f32 %v935_v59  ;;  %v1027_v42 = vmul.f32 %v1886_v10, %v2484_v4 }
 0x1c8   : > { %v2671_v0 = vmul.f32 %v1024_v8, %v786_v2  ;;  %1901 = vrcp.f32 %v936_v27  ;;  %v1888_v53 = vpop.eup %1887 }
 0x1c9   : > { %v2673_v34 = vmul.f32 %v1025_v16, %v788_v58  ;;  %1903 = vrcp.f32 %v937_v48  ;;  %v1028_v18 = vmul.f32 %v1888_v53, %v2488_v21 }
 0x1ca   : > { %v1076_v20 = vpack.c.bf16 %v2671_v0, %v2664_v40 }
 0x1cb   : > { %v1890_v11 = vpop.eup %1889  ;;  %v791_v15 = vpop.f32.mrb[40].mxu1  ;;  %v1077_v35 = vpack.c.bf16 %v2673_v34, %v2668_v23 }
 0x1cc   : > { %v1892_v28 = vpop.eup %1891  ;;  %v1015_v33 = vmul.f32 %v1890_v11, %v2590_v32  ;;  %v792_v51 = vadd.f32 %v791_v15, %v2526_v6  ;;  %v793_v31 = vpop.f32.mrb[41].mxu1 }
 0x1cd   : > { %v1894_v50 = vpop.eup %1893  ;;  %v794_v24 = vadd.f32 %v793_v31, %v2534_v5  ;;  %v795_v25 = vpop.f32.mrb[42].mxu1  ;;  %v1029_v57 = vmul.f32 %v1892_v28, %v2491_v26 }
 0x1ce   : > { %v1016_v63 = vmul.f32 %v1894_v50, %v2597_v36  ;;  %v1047_v32 = vmul.f32 %v1015_v33, %v764_v22  ;;  %v1058_v47 = vmul.f32 %v1026_v30, %v792_v51  ;;  %v796_v29 = vadd.f32 %v795_v25, %v2526_v6  ;;  %v797_v44 = vpop.f32.mrb[43].mxu1 }
 0x1cf   : > { %v1896_v54 = vpop.eup %1895  ;;  %v1059_v61 = vmul.f32 %v1027_v42, %v794_v24  ;;  %v798_v4 = vadd.f32 %v797_v44, %v2534_v5 }
 0x1d0   : > { %v1017_v21 = vmul.f32 %v1896_v54, %v2602_v46  ;;  %v1048_v59 = vmul.f32 %v1016_v63, %v766_v37  ;;  %v1060_v41 = vmul.f32 %v1028_v18, %v796_v29  ;;  %v1898_v62 = vpop.eup %1897 }
 0x1d1   : > { %v1061_v60 = vmul.f32 %v1029_v57, %v798_v4  ;;  %v1900_v9 = vpop.eup %1899  ;;  %v1030_v26 = vmul.f32 %v1898_v62, %v2502_v43 }
 0x1d2   : > { %v1049_v27 = vmul.f32 %v1017_v21, %v768_v45  ;;  %v1072_v36 = vpack.c.bf16 %v1048_v59, %v2642_v12  ;;  %v1078_v52 = vpack.c.bf16 %v1060_v41, %v1058_v47  ;;  %v1902_v19 = vpop.eup %1901  ;;  %v1031_v46 = vmul.f32 %v1900_v9, %v2511_v55 }
 0x1d3   : > { %v801_v56 = vpop.f32.mrb[44].mxu1  ;;  %v1079_v8 = vpack.c.bf16 %v1061_v60, %v1059_v61  ;;  %v1904_v48 = vpop.eup %1903  ;;  %v1032_v58 = vmul.f32 %v1902_v19, %v2530_v1  ;;  %v2714_v1 = vld [vmem:[%s2809_s6] ss:$0 sm:$0xff] }
 0x1d4   : > { %v1073_v40 = vpack.c.bf16 %v1049_v27, %v1047_v32  ;;  %v802_v2 = vadd.f32 %v801_v56, %v2526_v6  ;;  %v803_v7 = vpop.f32.mrb[45].mxu1  ;;  %v1033_v34 = vmul.f32 %v1904_v48, %v2538_v17 }
 0x1d5   : > { %v804_v16 = vadd.f32 %v803_v7, %v2534_v5  ;;  %v805_v23 = vpop.f32.mrb[46].mxu1 }
 0x1d6   : > { %1273 = vmatprep.mubr.bf16.mxu0 %v1073_v40  ;;  %v1062_v12 = vmul.f32 %v1030_v26, %v802_v2  ;;  %v806_v10 = vadd.f32 %v805_v23, %v2526_v6  ;;  %v807_v0 = vpop.f32.mrb[47].mxu1 }
 0x1d7   : > { %1274 = vmatmul.mubr.bf16.gmra.mrb[28].mxu0 %v1072_v36  ;;  %v1063_v43 = vmul.f32 %v1031_v46, %v804_v16  ;;  %v808_v53 = vadd.f32 %v807_v0, %v2534_v5 }
 0x1d8   : > { %1281 = vmatprep.mubr.bf16.mxu0 %v1075_v3  ;;  %v1064_v55 = vmul.f32 %v1032_v58, %v806_v10 }
 0x1d9   : > { %v1065_v22 = vmul.f32 %v1033_v34, %v808_v53 }
 0x1da   : > { %v1080_v11 = vpack.c.bf16 %v1064_v55, %v1062_v12 }
 0x1db   : > { %v1081_v15 = vpack.c.bf16 %v1065_v22, %v1063_v43 }
 0x1df   : > { %1282 = vmatmul.mubr.bf16.gmra.mrb[32].mxu0 %v1074_v39 }
 0x1e0   : > { %1289 = vmatprep.mubr.bf16.mxu0 %v1077_v35 }
 0x1e7   : > { %1290 = vmatmul.mubr.bf16.gmra.mrb[36].mxu0 %v1076_v20 }
 0x1e8   : > { %1297 = vmatprep.mubr.bf16.mxu0 %v1079_v8 }
 0x1ef   : > { %1298 = vmatmul.mubr.bf16.gmra.mrb[40].mxu0 %v1078_v52 }
 0x1f0   : > { %1305 = vmatprep.mubr.bf16.mxu0 %v1081_v15 }
 0x1f7   : > { %1306 = vmatmul.mubr.bf16.gmra.mrb[44].mxu0 %v1080_v11 }
 0x279   : > { %v1565_v6 = vpop.f32.mrb[16].mxu0 }
 0x27a   : > { %v1566_v5 = vpop.f32.mrb[17].mxu0 }
 0x27b   : > { %v1567_v17 = vadd.f32 %v1566_v5, %v1565_v6  ;;  %v1568_v38 = vpop.f32.mrb[18].mxu0 }
 0x27c   : > { %v1569_v49 = vpop.f32.mrb[19].mxu0 }
 0x27d   : > { %v1252_v13 = vadd.f32 %v1567_v17, %v2714_v1  ;;  %v1570_v14 = vadd.f32 %v1569_v49, %v1568_v38 }
 0x27f   : > { %1314 = vst [vmem:[%s2719_s19] sm:$0xff] %v1252_v13  ;;  %v1255_v39 = vadd.f32 %v1570_v14, %v2714_v1 }
 0x281   : > { %1315 = vst [vmem:[%s2719_s19 + $0x8] sm:$0xff] %v1255_v39 }
 0x28d   : > { %v1571_v3 = vpop.f32.mrb[20].mxu0 }
 0x28e   : > { %v1572_v20 = vpop.f32.mrb[21].mxu0 }
 0x28f   : > { %v1573_v35 = vadd.f32 %v1572_v20, %v1571_v3  ;;  %v1574_v28 = vpop.f32.mrb[22].mxu0 }
 0x290   : > { %v1575_v30 = vpop.f32.mrb[23].mxu0 }
 0x291   : > { %v1260_v33 = vadd.f32 %v1573_v35, %v2714_v1  ;;  %v1576_v37 = vadd.f32 %v1575_v30, %v1574_v28 }
 0x293   : > { %1316 = vst [vmem:[%s2719_s19 + $0x10] sm:$0xff] %v1260_v33  ;;  %v1263_v51 = vadd.f32 %v1576_v37, %v2714_v1 }
 0x295   : > { %1317 = vst [vmem:[%s2719_s19 + $0x18] sm:$0xff] %v1263_v51  ;;  %v1577_v31 = vpop.f32.mrb[24].mxu0 }
 0x296   : > { %v1578_v50 = vpop.f32.mrb[25].mxu0 }
 0x297   : > { %v1579_v42 = vadd.f32 %v1578_v50, %v1577_v31  ;;  %v1580_v18 = vpop.f32.mrb[26].mxu0 }
 0x298   : > { %v1581_v45 = vpop.f32.mrb[27].mxu0 }
 0x299   : > { %v1268_v24 = vadd.f32 %v1579_v42, %v2714_v1  ;;  %v1582_v25 = vadd.f32 %v1581_v45, %v1580_v18 }
 0x29b   : > { %1318 = vst [vmem:[%s2719_s19 + $0x20] sm:$0xff] %v1268_v24  ;;  %v1271_v63 = vadd.f32 %v1582_v25, %v2714_v1 }
 0x29d   : > { %1319 = vst [vmem:[%s2719_s19 + $0x28] sm:$0xff] %v1271_v63 }
 0x2aa   : > { %v1583_v32 = vpop.f32.mrb[28].mxu0 }
 0x2ab   : > { %v1584_v47 = vpop.f32.mrb[29].mxu0 }
 0x2ac   : > { %v1585_v29 = vadd.f32 %v1584_v47, %v1583_v32  ;;  %v1586_v44 = vpop.f32.mrb[30].mxu0 }
 0x2ad   : > { %v1587_v54 = vpop.f32.mrb[31].mxu0 }
 0x2ae   : > { %v1276_v57 = vadd.f32 %v1585_v29, %v2714_v1  ;;  %v1588_v61 = vadd.f32 %v1587_v54, %v1586_v44 }
 0x2b0   : > { %1320 = vst [vmem:[%s2719_s19 + $0x30] sm:$0xff] %v1276_v57  ;;  %v1279_v4 = vadd.f32 %v1588_v61, %v2714_v1 }
 0x2b2   : > { %1321 = vst [vmem:[%s2719_s19 + $0x38] sm:$0xff] %v1279_v4  ;;  %v1589_v21 = vpop.f32.mrb[32].mxu0 }
 0x2b3   : > { %v1590_v59 = vpop.f32.mrb[33].mxu0 }
 0x2b4   : > { %v1591_v41 = vadd.f32 %v1590_v59, %v1589_v21  ;;  %v1592_v62 = vpop.f32.mrb[34].mxu0 }
 0x2b5   : > { %v1593_v60 = vpop.f32.mrb[35].mxu0 }
 0x2b6   : > { %v1284_v9 = vadd.f32 %v1591_v41, %v2714_v1  ;;  %v1594_v27 = vadd.f32 %v1593_v60, %v1592_v62 }
 0x2b8   : > { %1322 = vst [vmem:[%s2719_s19 + $0x40] sm:$0xff] %v1284_v9  ;;  %v1287_v36 = vadd.f32 %v1594_v27, %v2714_v1 }
 0x2ba   : > { %1323 = vst [vmem:[%s2719_s19 + $0x48] sm:$0xff] %v1287_v36  ;;  %v1595_v52 = vpop.f32.mrb[36].mxu0 }
 0x2bb   : > { %v1596_v19 = vpop.f32.mrb[37].mxu0 }
 0x2bc   : > { %v1597_v56 = vadd.f32 %v1596_v19, %v1595_v52  ;;  %v1598_v8 = vpop.f32.mrb[38].mxu0 }
 0x2bd   : > { %v1599_v48 = vpop.f32.mrb[39].mxu0 }
 0x2be   : > { %v1292_v26 = vadd.f32 %v1597_v56, %v2714_v1  ;;  %v1600_v40 = vadd.f32 %v1599_v48, %v1598_v8 }
 0x2c0   : > { %1324 = vst [vmem:[%s2719_s19 + $0x50] sm:$0xff] %v1292_v26  ;;  %v1295_v2 = vadd.f32 %v1600_v40, %v2714_v1 }
 0x2c2   : > { %1325 = vst [vmem:[%s2719_s19 + $0x58] sm:$0xff] %v1295_v2  ;;  %v1601_v7 = vpop.f32.mrb[40].mxu0 }
 0x2c3   : > { %v1602_v46 = vpop.f32.mrb[41].mxu0 }
 0x2c4   : > { %v1603_v16 = vadd.f32 %v1602_v46, %v1601_v7  ;;  %v1604_v23 = vpop.f32.mrb[42].mxu0 }
 0x2c5   : > { %v1605_v58 = vpop.f32.mrb[43].mxu0 }
 0x2c6   : > { %v1300_v12 = vadd.f32 %v1603_v16, %v2714_v1  ;;  %v1606_v10 = vadd.f32 %v1605_v58, %v1604_v23 }
 0x2c8   : > { %1326 = vst [vmem:[%s2719_s19 + $0x60] sm:$0xff] %v1300_v12  ;;  %v1303_v0 = vadd.f32 %v1606_v10, %v2714_v1 }
 0x2ca   : > { %1327 = vst [vmem:[%s2719_s19 + $0x68] sm:$0xff] %v1303_v0  ;;  %v1607_v34 = vpop.f32.mrb[44].mxu0 }
 0x2cb   : > { %v1608_v43 = vpop.f32.mrb[45].mxu0 }
 0x2cc   : > { %v1609_v53 = vadd.f32 %v1608_v43, %v1607_v34  ;;  %v1610_v55 = vpop.f32.mrb[46].mxu0 }
 0x2cd   : > { %v1611_v22 = vpop.f32.mrb[47].mxu0 }
 0x2ce   : > { %v1308_v11 = vadd.f32 %v1609_v53, %v2714_v1  ;;  %v1612_v15 = vadd.f32 %v1611_v22, %v1610_v55 }
 0x2d0   : > { %1328 = vst [vmem:[%s2719_s19 + $0x70] sm:$0xff] %v1308_v11  ;;  %v1311_v6 = vadd.f32 %v1612_v15, %v2714_v1 }
 0x2d2   : > { %1329 = vst [vmem:[%s2719_s19 + $0x78] sm:$0xff] %v1311_v6 }
 0x2d3   : > { %2032 = shalt.err (!%p2029_p4)
}
 0x2d4   : > { %s2033_s13 = scalar_lea.hbm %s2754_s10, 2048  ;;  %s2037_s8 = scalar_lea.hbm %s2810_s7, 4096 }
 0x2d5   : > { %p2034_p9 = scmp.ne.s32.totalorder %s2754_s10, %s2033_s13  ;;  %p2038_p8 = scmp.lt.u32.totalorder %s2754_s10, %s2810_s7 }
 0x2d6   : > { %p2039_p13 = scmp.lt.u32.totalorder %s2037_s8, %s2033_s13  ;;  %p2041_p10 = scmp.lt.u32.totalorder %s2033_s13, %s2754_s10 }
 0x2d7   : > { %p2035_p0 = pnand %p2034_p9, %p2298_p5 }
 0x2d8   : > { %p2040_p6 = por %p2039_p13, %p2038_p8 }
 0x2d9   : > { %p2036_p11 = pneg %p2035_p0 }
 0x2da   : > { %p2042_p3 = por %p2041_p10, %p2040_p6 }
 0x2dc   : > { %p2043_p7 = pnand %p2042_p3, %p2036_p11 }
 0x2de   : > { %2046 = shalt.err (!%p2043_p7)
}
 0x2df   : > { %s2105_s16 = smov 128   ;;  %s2106_s11 = smov 8  }
 0x2e0   : > { %1643 = dma.vmem_to_hbm [thread:$0]  (%p2298_p5), %s2756_s29, 2048, %s2754_s10, %s1331_s28, %s2105_s16, %s2105_s16, %s2106_s11  }
 0x2e1 PF: > { %s2830_s22 = sld [smem:[#allocation15_spill]]  ;;  %s1359_s17 = sand.u32 1, %s2081_s24  }
 0x2e2   : > { %p2832_p1 = scmp.ge.s32.totalorder %s2093_s27, 2  ;;  %s1360_s30 = scalar_lea.sflag [#allocation4], %s1359_s17 }
 0x2e7   : > { %p2831_p12 = scmp.ne.s32.totalorder %s2830_s22, 0 }
 0x2e9   : > { %p1660_p2 = pnand %p2832_p1, %p2831_p12 }
 0x2eb   : > { %2076 = dma.done.wait (!%p1660_p2), %s1360_s30, 2048  }
 0x2ec   : > { %2078 = vsyncadd (!%p1660_p2), %s1360_s30, 4294965248  ;;  %p22_p4 = scmp.ge.s32.totalorder %s2284_s18, 4   ;;  %s2833_s24 = smov %s2085_s25 }
 0x2ed   : > { %s2834_s25 = smov %s2089_s26  ;;  %s2835_s26 = smov %s2294_s21 }
 0x2ee   : > { %s2836_s27 = smov %s2284_s18  ;;  %24 = sbr.rel (!%p22_p4) target bundleno = 7 (0x7), region = 105 }
 0x2f5   :  { %1365 = vsyncpa [#allocation3], 1 }
 0x2f6   :  { %1367 = vsyncpa [#allocation3 + $0x1], 1 }
 0x2f7   :  { %1368 = vsyncpa [#allocation6], 1 }
 0x2f8   :  { %1369 = vsyncpa [#allocation9], 1 }
 0x2f9   :  { %1370 = vsyncpa [#allocation4], 1 }
 0x2fa   :  { %1372 = vsyncpa [#allocation4 + $0x1], 1 }

</bundles_post_ra>
